<compile_context>
chip_gen: v7x
topology: tpu7x:2x2x1
jax: 0.10.0
libtpu: 0.0.40
codegen_flags: <defaults>
</compile_context>

<pallas_src>
import math

import numpy as np
import jax
import jax.numpy as jnp
from jax.experimental import pallas as pl
from jax.experimental.pallas import tpu as pltpu


# Tap order matches weight packing: t = kd*9 + kh*3 + kw, (dd,dh,dw)=(k-1).
_TAPS = tuple((dd, dh, dw) for dd in (-1, 0, 1) for dh in (-1, 0, 1) for dw in (-1, 0, 1))


def _round_up(x, m):
    return ((x + m - 1) // m) * m


def _boundary_masks(D, H, W, Cp):
    """(27*Cp, D*H*W) f32: rows [t*Cp:(t+1)*Cp] all equal mask of tap t.

    mask[t, p] = 1 iff tap t at output position p is in-bounds (zero padding).
    Pre-broadcast across Cp sublanes so the kernel never emits broadcast ops.
    """
    d = np.arange(D)[:, None, None]
    h = np.arange(H)[None, :, None]
    w = np.arange(W)[None, None, :]
    masks = np.zeros((27, D, H, W), np.float32)
    for t, (dd, dh, dw) in enumerate(_TAPS):
        ok = ((0 <= d + dd) & (d + dd < D) &
              (0 <= h + dh) & (h + dh < H) &
              (0 <= w + dw) & (w + dw < W))
        masks[t] = ok.astype(np.float32)
    masks = masks.reshape(27, 1, D * H * W)
    masks = np.broadcast_to(masks, (27, Cp, D * H * W)).reshape(27 * Cp, D * H * W)
    return jnp.asarray(np.ascontiguousarray(masks))


def _make_block_kernel(D, H, W, Cin_p, Cmid_p, Cout_p, Cmax):
    DHW = D * H * W

    def kernel(x_ref, w1_ref, w2_ref, m_ref, o_ref, col_ref):
        # x_ref  : (1, Cin_p, DHW)        one batch element, channels on sublanes
        # w1_ref : (Cmid_p, 27*Cin_p)     bf16 conv1 weights, taps packed into K
        # w2_ref : (Cout_p, 27*Cmid_p)    bf16 conv2 weights
        # m_ref  : (27*Cmax, DHW)         f32 boundary masks, broadcast over sublanes
        # o_ref  : (1, Cout_p, DHW)
        # col_ref: (27*Cmax, DHW)         f32 im2col scratch (never zero-filled)
        x = x_ref[0].astype(jnp.float32)                      # (Cin_p, DHW), lane-dense

        def im2col(src, C):
            # Rows [t*C:(t+1)*C] = mask[t] * (src shifted by tap t along lanes).
            # C is a multiple of 8 -> every store is an aligned full-width vst.
            for t, (dd, dh, dw) in enumerate(_TAPS):
                s = dd * H * W + dh * W + dw                  # flat spatial offset
                shifted = src if s == 0 else pltpu.roll(src, shift=(-s) % DHW, axis=1)
                col_ref[t * C:(t + 1) * C, :] = shifted * m_ref[t * Cmax:t * Cmax + C, :]
            # bf16 operand for the MXU, f32 accumulation happens in the dot.
            return col_ref[0:27 * C, :].astype(jnp.bfloat16)

        # conv1 + ReLU: single (Cmid_p, 27*Cin_p) @ (27*Cin_p, DHW) bf16 MXU matmul.
        h1 = jnp.maximum(
            jnp.dot(w1_ref[...], im2col(x, Cin_p),
                    preferred_element_type=jnp.float32), 0.0)     # (Cmid_p, DHW) f32

        # conv2: single (Cout_p, 27*Cmid_p) @ (27*Cmid_p, DHW) bf16 MXU matmul.
        out = jnp.dot(w2_ref[...], im2col(h1, Cmid_p),
                      preferred_element_type=jnp.float32)         # (Cout_p, DHW) f32

        # residual add (downsample=None -> identity) + final ReLU.
        # Re-load x from VMEM instead of keeping it live across both convs.
        res = x_ref[0].astype(jnp.float32)
        o_ref[0] = jnp.maximum(out + res, 0.0).astype(o_ref.dtype)

    return kernel


def basic_block_3d_forward(x_ncdhw, w1_oidhw, w2_oidhw):
    """Forward of BasicBlock3D (stride=1, downsample=None). x in NCDHW."""
    N, Cin, D, H, W = x_ncdhw.shape
    Cmid = w1_oidhw.shape[0]
    Cout = w2_oidhw.shape[0]
    assert Cin == Cout, "residual add requires inplanes == planes (downsample=None)"
    DHW = D * H * W

    # Pad channel dims to multiples of 8: aligned im2col stores + full MXU M tiles.
    Cin_p = _round_up(Cin, 8)
    Cmid_p = _round_up(Cmid, 8)
    Cout_p = _round_up(Cout, 8)          # == Cin_p because Cin == Cout
    Cmax = max(Cin_p, Cmid_p)

    # NCDHW -> NC(DHW): pure reshape (no transpose); spatial dim lands on lanes.
    x = x_ncdhw.reshape(N, Cin, DHW)
    if Cin_p != Cin:
        x = jnp.pad(x, ((0, 0), (0, Cin_p - Cin), (0, 0)))

    # OIDHW -> (O, kd, kh, kw, I) -> pad -> (O_p, 27*I_p), bf16. Padded rows/cols
    # are zero, so padded channels contribute nothing and padded outputs are 0.
    def pack(w, co_p, ci_p):
        co, ci = w.shape[0], w.shape[1]
        wt = jnp.transpose(w, (0, 2, 3, 4, 1))                 # (co, 3, 3, 3, ci)
        wt = jnp.pad(wt, ((0, co_p - co), (0, 0), (0, 0), (0, 0), (0, ci_p - ci)))
        return wt.reshape(co_p, 27 * ci_p).astype(jnp.bfloat16)

    w1p = pack(w1_oidhw, Cmid_p, Cin_p)
    w2p = pack(w2_oidhw, Cout_p, Cmid_p)

    masks = _boundary_masks(D, H, W, Cmax)                     # (27*Cmax, DHW) f32

    kernel = _make_block_kernel(D, H, W, Cin_p, Cmid_p, Cout_p, Cmax)

    flops = int(2 * N * DHW * 27 * (Cin_p * Cmid_p + Cmid_p * Cout_p))
    bytes_accessed = int(4 * N * (Cin_p + Cout_p) * DHW
                         + 2 * 27 * (Cin_p * Cmid_p + Cmid_p * Cout_p)
                         + 4 * 27 * Cmax * DHW)
    cost = pl.CostEstimate(flops=flops, transcendentals=0,
                           bytes_accessed=bytes_accessed)

    out = pl.pallas_call(
        kernel,
        out_shape=jax.ShapeDtypeStruct((N, Cout_p, DHW), x_ncdhw.dtype),
        grid_spec=pltpu.PrefetchScalarGridSpec(
            num_scalar_prefetch=0,
            grid=(N,),
            in_specs=[
                pl.BlockSpec((1, Cin_p, DHW), lambda n: (n, 0, 0)),
                pl.BlockSpec((Cmid_p, 27 * Cin_p), lambda n: (0, 0)),   # resident
                pl.BlockSpec((Cout_p, 27 * Cmid_p), lambda n: (0, 0)),  # resident
                pl.BlockSpec((27 * Cmax, DHW), lambda n: (0, 0)),       # resident
            ],
            out_specs=pl.BlockSpec((1, Cout_p, DHW), lambda n: (n, 0, 0)),
            scratch_shapes=[pltpu.VMEM((27 * Cmax, DHW), jnp.float32)],
        ),
        # Batch elements are independent -> parallel lets v7x split over 2 TCs.
        compiler_params=pltpu.CompilerParams(dimension_semantics=("parallel",)),
        cost_estimate=cost,
    )(x, w1p, w2p, masks)

    # Drop padded channels, restore NCDHW.
    out = out[:, :Cout, :]
    return out.reshape(N, Cout, D, H, W)


# ---------------- parameter setup (plain JAX glue) ----------------

def xavier_uniform(key, shape, gain):
    # shape = (out_ch, in_ch, kd, kh, kw) ; matches torch.nn.init.xavier_uniform_
    rf = shape[2] * shape[3] * shape[4]
    fan_in = shape[1] * rf
    fan_out = shape[0] * rf
    bound = gain * math.sqrt(6.0 / (fan_in + fan_out))
    return jax.random.uniform(key, shape, jnp.float32, -bound, bound)


def spectral_normalize(w, key, n_power_iterations=1, eps=1e-12):
    # Mirrors torch.nn.utils.spectral_norm: W_mat = W.reshape(out_ch, -1),
    # one power-iteration step from a deterministic random u, W / sigma.
    co = w.shape[0]
    wm = w.reshape(co, -1)
    u = jax.random.normal(key, (co,), jnp.float32)
    u = u / (jnp.linalg.norm(u) + eps)
    v = None
    for _ in range(n_power_iterations):
        v = wm.T @ u
        v = v / (jnp.linalg.norm(v) + eps)
        u = wm @ v
        u = u / (jnp.linalg.norm(u) + eps)
    sigma = u @ (wm @ v)
    return w / sigma


def reference_forward(x, w1, w2):
    dn = ("NCDHW", "OIDHW", "NCDHW")
    pad = ((1, 1), (1, 1), (1, 1))
    prec = jax.lax.Precision.HIGHEST
    out = jax.lax.conv_general_dilated(x, w1, (1, 1, 1), pad,
                                       dimension_numbers=dn, precision=prec)
    out = jnp.maximum(out, 0.0)
    out = jax.lax.conv_general_dilated(out, w2, (1, 1, 1), pad,
                                       dimension_numbers=dn, precision=prec)
    out = jnp.maximum(out + x, 0.0)
    return out


if __name__ == "__main__":
    key = jax.random.PRNGKey(0)
    k_x, k_w1, k_w2, k_u1, k_u2 = jax.random.split(key, 5)

    # inplanes == planes, stride=1, downsample=None (identity residual)
    N, C, D, H, W = 2, 4, 8, 8, 8
    x = jax.random.normal(k_x, (N, C, D, H, W), jnp.float32)

    gain = math.sqrt(2.0)
    w1 = spectral_normalize(xavier_uniform(k_w1, (C, C, 3, 3, 3), gain), k_u1)
    w2 = spectral_normalize(xavier_uniform(k_w2, (C, C, 3, 3, 3), gain), k_u2)

    out = basic_block_3d_forward(x, w1, w2)
    out = jax.block_until_ready(out)

    ref = reference_forward(x, w1, w2)
    assert out.shape == ref.shape == (N, C, D, H, W)
    if not jnp.allclose(out, ref, atol=2e-2, rtol=2e-2):
        max_err = float(jnp.max(jnp.abs(out - ref)))
        raise AssertionError(f"Pallas output mismatch vs reference, max_err={max_err}")

    print("KERNEL_OK")
</pallas_src>

<mosaic_0001>
module attributes {stable_mosaic.version = 11 : i64} {
  func.func @kernel(%arg0: i32, %arg1: memref<1x8x512xf32, #tpu.memory_space<vmem>>, %arg2: memref<8x216xbf16, #tpu.memory_space<vmem>>, %arg3: memref<8x216xbf16, #tpu.memory_space<vmem>>, %arg4: memref<216x512xf32, #tpu.memory_space<vmem>>, %arg5: memref<1x8x512xf32, #tpu.memory_space<vmem>>, %arg6: memref<216x512xf32, #tpu.memory_space<vmem>>) attributes {dimension_semantics = [#tpu.dimension_semantics<parallel>], iteration_bounds = array<i64: 2>, scalar_prefetch = 0 : i64, scratch_operands = 1 : i64, tpu.core_type = #tpu.core_type<tc>, window_params = [{transform_indices = @transform_0, window_bounds = array<i64: 1, 8, 512>}, {pipeline_mode = #tpu.pipeline_mode<synchronous>, transform_indices = @transform_1, window_bounds = array<i64: 8, 216>}, {pipeline_mode = #tpu.pipeline_mode<synchronous>, transform_indices = @transform_2, window_bounds = array<i64: 8, 216>}, {pipeline_mode = #tpu.pipeline_mode<synchronous>, transform_indices = @transform_3, window_bounds = array<i64: 216, 512>}, {transform_indices = @transform_4, window_bounds = array<i64: 1, 8, 512>}]} {
    %c0 = arith.constant 0 : index
    %c0_0 = arith.constant 0 : index
    %c0_1 = arith.constant 0 : index
    %0 = vector.load %arg1[%c0, %c0_0, %c0_1] : memref<1x8x512xf32, #tpu.memory_space<vmem>>, vector<1x8x512xf32>
    %1 = vector.shape_cast %0 : vector<1x8x512xf32> to vector<8x512xf32>
    %c0_2 = arith.constant 0 : index
    %c0_3 = arith.constant 0 : index
    %2 = vector.load %arg2[%c0_2, %c0_3] : memref<8x216xbf16, #tpu.memory_space<vmem>>, vector<8x216xbf16>
    %c73_i32 = arith.constant 73 : i32
    %3 = tpu.dynamic_rotate %1 by %c73_i32 dim 1 : vector<8x512xf32>, i32 -> vector<8x512xf32>
    %c0_4 = arith.constant 0 : index
    %c0_5 = arith.constant 0 : index
    %4 = vector.load %arg4[%c0_4, %c0_5] : memref<216x512xf32, #tpu.memory_space<vmem>>, vector<8x512xf32>
    %5 = arith.mulf %3, %4 : vector<8x512xf32>
    %c0_6 = arith.constant 0 : index
    %c0_7 = arith.constant 0 : index
    %6 = vector.load %arg6[%c0_6, %c0_7] : memref<216x512xf32, #tpu.memory_space<vmem>>, vector<8x512xf32>
    tpu.vector_store %arg6[%c0_6, %c0_7], %5 {strides = array<i32>} : memref<216x512xf32, #tpu.memory_space<vmem>>, vector<8x512xf32>,
    %c72_i32 = arith.constant 72 : i32
    %7 = tpu.dynamic_rotate %1 by %c72_i32 dim 1 : vector<8x512xf32>, i32 -> vector<8x512xf32>
    %c8 = arith.constant 8 : index
    %c0_8 = arith.constant 0 : index
    %8 = vector.load %arg4[%c8, %c0_8] : memref<216x512xf32, #tpu.memory_space<vmem>>, vector<8x512xf32>
    %9 = arith.mulf %7, %8 : vector<8x512xf32>
    %c8_9 = arith.constant 8 : index
    %c0_10 = arith.constant 0 : index
    %10 = vector.load %arg6[%c8_9, %c0_10] : memref<216x512xf32, #tpu.memory_space<vmem>>, vector<8x512xf32>
    tpu.vector_store %arg6[%c8_9, %c0_10], %9 {strides = array<i32>} : memref<216x512xf32, #tpu.memory_space<vmem>>, vector<8x512xf32>,
    %c71_i32 = arith.constant 71 : i32
    %11 = tpu.dynamic_rotate %1 by %c71_i32 dim 1 : vector<8x512xf32>, i32 -> vector<8x512xf32>
    %c16 = arith.constant 16 : index
    %c0_11 = arith.constant 0 : index
    %12 = vector.load %arg4[%c16, %c0_11] : memref<216x512xf32, #tpu.memory_space<vmem>>, vector<8x512xf32>
    %13 = arith.mulf %11, %12 : vector<8x512xf32>
    %c16_12 = arith.constant 16 : index
    %c0_13 = arith.constant 0 : index
    %14 = vector.load %arg6[%c16_12, %c0_13] : memref<216x512xf32, #tpu.memory_space<vmem>>, vector<8x512xf32>
    tpu.vector_store %arg6[%c16_12, %c0_13], %13 {strides = array<i32>} : memref<216x512xf32, #tpu.memory_space<vmem>>, vector<8x512xf32>,
    %c65_i32 = arith.constant 65 : i32
    %15 = tpu.dynamic_rotate %1 by %c65_i32 dim 1 : vector<8x512xf32>, i32 -> vector<8x512xf32>
    %c24 = arith.constant 24 : index
    %c0_14 = arith.constant 0 : index
    %16 = vector.load %arg4[%c24, %c0_14] : memref<216x512xf32, #tpu.memory_space<vmem>>, vector<8x512xf32>
    %17 = arith.mulf %15, %16 : vector<8x512xf32>
    %c24_15 = arith.constant 24 : index
    %c0_16 = arith.constant 0 : index
    %18 = vector.load %arg6[%c24_15, %c0_16] : memref<216x512xf32, #tpu.memory_space<vmem>>, vector<8x512xf32>
    tpu.vector_store %arg6[%c24_15, %c0_16], %17 {strides = array<i32>} : memref<216x512xf32, #tpu.memory_space<vmem>>, vector<8x512xf32>,
    %c64_i32 = arith.constant 64 : i32
    %19 = tpu.dynamic_rotate %1 by %c64_i32 dim 1 : vector<8x512xf32>, i32 -> vector<8x512xf32>
    %c32 = arith.constant 32 : index
    %c0_17 = arith.constant 0 : index
    %20 = vector.load %arg4[%c32, %c0_17] : memref<216x512xf32, #tpu.memory_space<vmem>>, vector<8x512xf32>
    %21 = arith.mulf %19, %20 : vector<8x512xf32>
    %c32_18 = arith.constant 32 : index
    %c0_19 = arith.constant 0 : index
    %22 = vector.load %arg6[%c32_18, %c0_19] : memref<216x512xf32, #tpu.memory_space<vmem>>, vector<8x512xf32>
    tpu.vector_store %arg6[%c32_18, %c0_19], %21 {strides = array<i32>} : memref<216x512xf32, #tpu.memory_space<vmem>>, vector<8x512xf32>,
    %c63_i32 = arith.constant 63 : i32
    %23 = tpu.dynamic_rotate %1 by %c63_i32 dim 1 : vector<8x512xf32>, i32 -> vector<8x512xf32>
    %c40 = arith.constant 40 : index
    %c0_20 = arith.constant 0 : index
    %24 = vector.load %arg4[%c40, %c0_20] : memref<216x512xf32, #tpu.memory_space<vmem>>, vector<8x512xf32>
    %25 = arith.mulf %23, %24 : vector<8x512xf32>
    %c40_21 = arith.constant 40 : index
    %c0_22 = arith.constant 0 : index
    %26 = vector.load %arg6[%c40_21, %c0_22] : memref<216x512xf32, #tpu.memory_space<vmem>>, vector<8x512xf32>
    tpu.vector_store %arg6[%c40_21, %c0_22], %25 {strides = array<i32>} : memref<216x512xf32, #tpu.memory_space<vmem>>, vector<8x512xf32>,
    %c57_i32 = arith.constant 57 : i32
    %27 = tpu.dynamic_rotate %1 by %c57_i32 dim 1 : vector<8x512xf32>, i32 -> vector<8x512xf32>
    %c48 = arith.constant 48 : index
    %c0_23 = arith.constant 0 : index
    %28 = vector.load %arg4[%c48, %c0_23] : memref<216x512xf32, #tpu.memory_space<vmem>>, vector<8x512xf32>
    %29 = arith.mulf %27, %28 : vector<8x512xf32>
    %c48_24 = arith.constant 48 : index
    %c0_25 = arith.constant 0 : index
    %30 = vector.load %arg6[%c48_24, %c0_25] : memref<216x512xf32, #tpu.memory_space<vmem>>, vector<8x512xf32>
    tpu.vector_store %arg6[%c48_24, %c0_25], %29 {strides = array<i32>} : memref<216x512xf32, #tpu.memory_space<vmem>>, vector<8x512xf32>,
    %c56_i32 = arith.constant 56 : i32
    %31 = tpu.dynamic_rotate %1 by %c56_i32 dim 1 : vector<8x512xf32>, i32 -> vector<8x512xf32>
    %c56 = arith.constant 56 : index
    %c0_26 = arith.constant 0 : index
    %32 = vector.load %arg4[%c56, %c0_26] : memref<216x512xf32, #tpu.memory_space<vmem>>, vector<8x512xf32>
    %33 = arith.mulf %31, %32 : vector<8x512xf32>
    %c56_27 = arith.constant 56 : index
    %c0_28 = arith.constant 0 : index
    %34 = vector.load %arg6[%c56_27, %c0_28] : memref<216x512xf32, #tpu.memory_space<vmem>>, vector<8x512xf32>
    tpu.vector_store %arg6[%c56_27, %c0_28], %33 {strides = array<i32>} : memref<216x512xf32, #tpu.memory_space<vmem>>, vector<8x512xf32>,
    %c55_i32 = arith.constant 55 : i32
    %35 = tpu.dynamic_rotate %1 by %c55_i32 dim 1 : vector<8x512xf32>, i32 -> vector<8x512xf32>
    %c64 = arith.constant 64 : index
    %c0_29 = arith.constant 0 : index
    %36 = vector.load %arg4[%c64, %c0_29] : memref<216x512xf32, #tpu.memory_space<vmem>>, vector<8x512xf32>
    %37 = arith.mulf %35, %36 : vector<8x512xf32>
    %c64_30 = arith.constant 64 : index
    %c0_31 = arith.constant 0 : index
    %38 = vector.load %arg6[%c64_30, %c0_31] : memref<216x512xf32, #tpu.memory_space<vmem>>, vector<8x512xf32>
    tpu.vector_store %arg6[%c64_30, %c0_31], %37 {strides = array<i32>} : memref<216x512xf32, #tpu.memory_space<vmem>>, vector<8x512xf32>,
    %c9_i32 = arith.constant 9 : i32
    %39 = tpu.dynamic_rotate %1 by %c9_i32 dim 1 : vector<8x512xf32>, i32 -> vector<8x512xf32>
    %c72 = arith.constant 72 : index
    %c0_32 = arith.constant 0 : index
    %40 = vector.load %arg4[%c72, %c0_32] : memref<216x512xf32, #tpu.memory_space<vmem>>, vector<8x512xf32>
    %41 = arith.mulf %39, %40 : vector<8x512xf32>
    %c72_33 = arith.constant 72 : index
    %c0_34 = arith.constant 0 : index
    %42 = vector.load %arg6[%c72_33, %c0_34] : memref<216x512xf32, #tpu.memory_space<vmem>>, vector<8x512xf32>
    tpu.vector_store %arg6[%c72_33, %c0_34], %41 {strides = array<i32>} : memref<216x512xf32, #tpu.memory_space<vmem>>, vector<8x512xf32>,
    %c8_i32 = arith.constant 8 : i32
    %43 = tpu.dynamic_rotate %1 by %c8_i32 dim 1 : vector<8x512xf32>, i32 -> vector<8x512xf32>
    %c80 = arith.constant 80 : index
    %c0_35 = arith.constant 0 : index
    %44 = vector.load %arg4[%c80, %c0_35] : memref<216x512xf32, #tpu.memory_space<vmem>>, vector<8x512xf32>
    %45 = arith.mulf %43, %44 : vector<8x512xf32>
    %c80_36 = arith.constant 80 : index
    %c0_37 = arith.constant 0 : index
    %46 = vector.load %arg6[%c80_36, %c0_37] : memref<216x512xf32, #tpu.memory_space<vmem>>, vector<8x512xf32>
    tpu.vector_store %arg6[%c80_36, %c0_37], %45 {strides = array<i32>} : memref<216x512xf32, #tpu.memory_space<vmem>>, vector<8x512xf32>,
    %c7_i32 = arith.constant 7 : i32
    %47 = tpu.dynamic_rotate %1 by %c7_i32 dim 1 : vector<8x512xf32>, i32 -> vector<8x512xf32>
    %c88 = arith.constant 88 : index
    %c0_38 = arith.constant 0 : index
    %48 = vector.load %arg4[%c88, %c0_38] : memref<216x512xf32, #tpu.memory_space<vmem>>, vector<8x512xf32>
    %49 = arith.mulf %47, %48 : vector<8x512xf32>
    %c88_39 = arith.constant 88 : index
    %c0_40 = arith.constant 0 : index
    %50 = vector.load %arg6[%c88_39, %c0_40] : memref<216x512xf32, #tpu.memory_space<vmem>>, vector<8x512xf32>
    tpu.vector_store %arg6[%c88_39, %c0_40], %49 {strides = array<i32>} : memref<216x512xf32, #tpu.memory_space<vmem>>, vector<8x512xf32>,
    %c1_i32 = arith.constant 1 : i32
    %51 = tpu.dynamic_rotate %1 by %c1_i32 dim 1 : vector<8x512xf32>, i32 -> vector<8x512xf32>
    %c96 = arith.constant 96 : index
    %c0_41 = arith.constant 0 : index
    %52 = vector.load %arg4[%c96, %c0_41] : memref<216x512xf32, #tpu.memory_space<vmem>>, vector<8x512xf32>
    %53 = arith.mulf %51, %52 : vector<8x512xf32>
    %c96_42 = arith.constant 96 : index
    %c0_43 = arith.constant 0 : index
    %54 = vector.load %arg6[%c96_42, %c0_43] : memref<216x512xf32, #tpu.memory_space<vmem>>, vector<8x512xf32>
    tpu.vector_store %arg6[%c96_42, %c0_43], %53 {strides = array<i32>} : memref<216x512xf32, #tpu.memory_space<vmem>>, vector<8x512xf32>,
    %c104 = arith.constant 104 : index
    %c0_44 = arith.constant 0 : index
    %55 = vector.load %arg4[%c104, %c0_44] : memref<216x512xf32, #tpu.memory_space<vmem>>, vector<8x512xf32>
    %56 = arith.mulf %1, %55 : vector<8x512xf32>
    %c104_45 = arith.constant 104 : index
    %c0_46 = arith.constant 0 : index
    %57 = vector.load %arg6[%c104_45, %c0_46] : memref<216x512xf32, #tpu.memory_space<vmem>>, vector<8x512xf32>
    tpu.vector_store %arg6[%c104_45, %c0_46], %56 {strides = array<i32>} : memref<216x512xf32, #tpu.memory_space<vmem>>, vector<8x512xf32>,
    %c511_i32 = arith.constant 511 : i32
    %58 = tpu.dynamic_rotate %1 by %c511_i32 dim 1 : vector<8x512xf32>, i32 -> vector<8x512xf32>
    %c112 = arith.constant 112 : index
    %c0_47 = arith.constant 0 : index
    %59 = vector.load %arg4[%c112, %c0_47] : memref<216x512xf32, #tpu.memory_space<vmem>>, vector<8x512xf32>
    %60 = arith.mulf %58, %59 : vector<8x512xf32>
    %c112_48 = arith.constant 112 : index
    %c0_49 = arith.constant 0 : index
    %61 = vector.load %arg6[%c112_48, %c0_49] : memref<216x512xf32, #tpu.memory_space<vmem>>, vector<8x512xf32>
    tpu.vector_store %arg6[%c112_48, %c0_49], %60 {strides = array<i32>} : memref<216x512xf32, #tpu.memory_space<vmem>>, vector<8x512xf32>,
    %c505_i32 = arith.constant 505 : i32
    %62 = tpu.dynamic_rotate %1 by %c505_i32 dim 1 : vector<8x512xf32>, i32 -> vector<8x512xf32>
    %c120 = arith.constant 120 : index
    %c0_50 = arith.constant 0 : index
    %63 = vector.load %arg4[%c120, %c0_50] : memref<216x512xf32, #tpu.memory_space<vmem>>, vector<8x512xf32>
    %64 = arith.mulf %62, %63 : vector<8x512xf32>
    %c120_51 = arith.constant 120 : index
    %c0_52 = arith.constant 0 : index
    %65 = vector.load %arg6[%c120_51, %c0_52] : memref<216x512xf32, #tpu.memory_space<vmem>>, vector<8x512xf32>
    tpu.vector_store %arg6[%c120_51, %c0_52], %64 {strides = array<i32>} : memref<216x512xf32, #tpu.memory_space<vmem>>, vector<8x512xf32>,
    %c504_i32 = arith.constant 504 : i32
    %66 = tpu.dynamic_rotate %1 by %c504_i32 dim 1 : vector<8x512xf32>, i32 -> vector<8x512xf32>
    %c128 = arith.constant 128 : index
    %c0_53 = arith.constant 0 : index
    %67 = vector.load %arg4[%c128, %c0_53] : memref<216x512xf32, #tpu.memory_space<vmem>>, vector<8x512xf32>
    %68 = arith.mulf %66, %67 : vector<8x512xf32>
    %c128_54 = arith.constant 128 : index
    %c0_55 = arith.constant 0 : index
    %69 = vector.load %arg6[%c128_54, %c0_55] : memref<216x512xf32, #tpu.memory_space<vmem>>, vector<8x512xf32>
    tpu.vector_store %arg6[%c128_54, %c0_55], %68 {strides = array<i32>} : memref<216x512xf32, #tpu.memory_space<vmem>>, vector<8x512xf32>,
    %c503_i32 = arith.constant 503 : i32
    %70 = tpu.dynamic_rotate %1 by %c503_i32 dim 1 : vector<8x512xf32>, i32 -> vector<8x512xf32>
    %c136 = arith.constant 136 : index
    %c0_56 = arith.constant 0 : index
    %71 = vector.load %arg4[%c136, %c0_56] : memref<216x512xf32, #tpu.memory_space<vmem>>, vector<8x512xf32>
    %72 = arith.mulf %70, %71 : vector<8x512xf32>
    %c136_57 = arith.constant 136 : index
    %c0_58 = arith.constant 0 : index
    %73 = vector.load %arg6[%c136_57, %c0_58] : memref<216x512xf32, #tpu.memory_space<vmem>>, vector<8x512xf32>
    tpu.vector_store %arg6[%c136_57, %c0_58], %72 {strides = array<i32>} : memref<216x512xf32, #tpu.memory_space<vmem>>, vector<8x512xf32>,
    %c457_i32 = arith.constant 457 : i32
    %74 = tpu.dynamic_rotate %1 by %c457_i32 dim 1 : vector<8x512xf32>, i32 -> vector<8x512xf32>
    %c144 = arith.constant 144 : index
    %c0_59 = arith.constant 0 : index
    %75 = vector.load %arg4[%c144, %c0_59] : memref<216x512xf32, #tpu.memory_space<vmem>>, vector<8x512xf32>
    %76 = arith.mulf %74, %75 : vector<8x512xf32>
    %c144_60 = arith.constant 144 : index
    %c0_61 = arith.constant 0 : index
    %77 = vector.load %arg6[%c144_60, %c0_61] : memref<216x512xf32, #tpu.memory_space<vmem>>, vector<8x512xf32>
    tpu.vector_store %arg6[%c144_60, %c0_61], %76 {strides = array<i32>} : memref<216x512xf32, #tpu.memory_space<vmem>>, vector<8x512xf32>,
    %c456_i32 = arith.constant 456 : i32
    %78 = tpu.dynamic_rotate %1 by %c456_i32 dim 1 : vector<8x512xf32>, i32 -> vector<8x512xf32>
    %c152 = arith.constant 152 : index
    %c0_62 = arith.constant 0 : index
    %79 = vector.load %arg4[%c152, %c0_62] : memref<216x512xf32, #tpu.memory_space<vmem>>, vector<8x512xf32>
    %80 = arith.mulf %78, %79 : vector<8x512xf32>
    %c152_63 = arith.constant 152 : index
    %c0_64 = arith.constant 0 : index
    %81 = vector.load %arg6[%c152_63, %c0_64] : memref<216x512xf32, #tpu.memory_space<vmem>>, vector<8x512xf32>
    tpu.vector_store %arg6[%c152_63, %c0_64], %80 {strides = array<i32>} : memref<216x512xf32, #tpu.memory_space<vmem>>, vector<8x512xf32>,
    %c455_i32 = arith.constant 455 : i32
    %82 = tpu.dynamic_rotate %1 by %c455_i32 dim 1 : vector<8x512xf32>, i32 -> vector<8x512xf32>
    %c160 = arith.constant 160 : index
    %c0_65 = arith.constant 0 : index
    %83 = vector.load %arg4[%c160, %c0_65] : memref<216x512xf32, #tpu.memory_space<vmem>>, vector<8x512xf32>
    %84 = arith.mulf %82, %83 : vector<8x512xf32>
    %c160_66 = arith.constant 160 : index
    %c0_67 = arith.constant 0 : index
    %85 = vector.load %arg6[%c160_66, %c0_67] : memref<216x512xf32, #tpu.memory_space<vmem>>, vector<8x512xf32>
    tpu.vector_store %arg6[%c160_66, %c0_67], %84 {strides = array<i32>} : memref<216x512xf32, #tpu.memory_space<vmem>>, vector<8x512xf32>,
    %c449_i32 = arith.constant 449 : i32
    %86 = tpu.dynamic_rotate %1 by %c449_i32 dim 1 : vector<8x512xf32>, i32 -> vector<8x512xf32>
    %c168 = arith.constant 168 : index
    %c0_68 = arith.constant 0 : index
    %87 = vector.load %arg4[%c168, %c0_68] : memref<216x512xf32, #tpu.memory_space<vmem>>, vector<8x512xf32>
    %88 = arith.mulf %86, %87 : vector<8x512xf32>
    %c168_69 = arith.constant 168 : index
    %c0_70 = arith.constant 0 : index
    %89 = vector.load %arg6[%c168_69, %c0_70] : memref<216x512xf32, #tpu.memory_space<vmem>>, vector<8x512xf32>
    tpu.vector_store %arg6[%c168_69, %c0_70], %88 {strides = array<i32>} : memref<216x512xf32, #tpu.memory_space<vmem>>, vector<8x512xf32>,
    %c448_i32 = arith.constant 448 : i32
    %90 = tpu.dynamic_rotate %1 by %c448_i32 dim 1 : vector<8x512xf32>, i32 -> vector<8x512xf32>
    %c176 = arith.constant 176 : index
    %c0_71 = arith.constant 0 : index
    %91 = vector.load %arg4[%c176, %c0_71] : memref<216x512xf32, #tpu.memory_space<vmem>>, vector<8x512xf32>
    %92 = arith.mulf %90, %91 : vector<8x512xf32>
    %c176_72 = arith.constant 176 : index
    %c0_73 = arith.constant 0 : index
    %93 = vector.load %arg6[%c176_72, %c0_73] : memref<216x512xf32, #tpu.memory_space<vmem>>, vector<8x512xf32>
    tpu.vector_store %arg6[%c176_72, %c0_73], %92 {strides = array<i32>} : memref<216x512xf32, #tpu.memory_space<vmem>>, vector<8x512xf32>,
    %c447_i32 = arith.constant 447 : i32
    %94 = tpu.dynamic_rotate %1 by %c447_i32 dim 1 : vector<8x512xf32>, i32 -> vector<8x512xf32>
    %c184 = arith.constant 184 : index
    %c0_74 = arith.constant 0 : index
    %95 = vector.load %arg4[%c184, %c0_74] : memref<216x512xf32, #tpu.memory_space<vmem>>, vector<8x512xf32>
    %96 = arith.mulf %94, %95 : vector<8x512xf32>
    %c184_75 = arith.constant 184 : index
    %c0_76 = arith.constant 0 : index
    %97 = vector.load %arg6[%c184_75, %c0_76] : memref<216x512xf32, #tpu.memory_space<vmem>>, vector<8x512xf32>
    tpu.vector_store %arg6[%c184_75, %c0_76], %96 {strides = array<i32>} : memref<216x512xf32, #tpu.memory_space<vmem>>, vector<8x512xf32>,
    %c441_i32 = arith.constant 441 : i32
    %98 = tpu.dynamic_rotate %1 by %c441_i32 dim 1 : vector<8x512xf32>, i32 -> vector<8x512xf32>
    %c192 = arith.constant 192 : index
    %c0_77 = arith.constant 0 : index
    %99 = vector.load %arg4[%c192, %c0_77] : memref<216x512xf32, #tpu.memory_space<vmem>>, vector<8x512xf32>
    %100 = arith.mulf %98, %99 : vector<8x512xf32>
    %c192_78 = arith.constant 192 : index
    %c0_79 = arith.constant 0 : index
    %101 = vector.load %arg6[%c192_78, %c0_79] : memref<216x512xf32, #tpu.memory_space<vmem>>, vector<8x512xf32>
    tpu.vector_store %arg6[%c192_78, %c0_79], %100 {strides = array<i32>} : memref<216x512xf32, #tpu.memory_space<vmem>>, vector<8x512xf32>,
    %c440_i32 = arith.constant 440 : i32
    %102 = tpu.dynamic_rotate %1 by %c440_i32 dim 1 : vector<8x512xf32>, i32 -> vector<8x512xf32>
    %c200 = arith.constant 200 : index
    %c0_80 = arith.constant 0 : index
    %103 = vector.load %arg4[%c200, %c0_80] : memref<216x512xf32, #tpu.memory_space<vmem>>, vector<8x512xf32>
    %104 = arith.mulf %102, %103 : vector<8x512xf32>
    %c200_81 = arith.constant 200 : index
    %c0_82 = arith.constant 0 : index
    %105 = vector.load %arg6[%c200_81, %c0_82] : memref<216x512xf32, #tpu.memory_space<vmem>>, vector<8x512xf32>
    tpu.vector_store %arg6[%c200_81, %c0_82], %104 {strides = array<i32>} : memref<216x512xf32, #tpu.memory_space<vmem>>, vector<8x512xf32>,
    %c439_i32 = arith.constant 439 : i32
    %106 = tpu.dynamic_rotate %1 by %c439_i32 dim 1 : vector<8x512xf32>, i32 -> vector<8x512xf32>
    %c208 = arith.constant 208 : index
    %c0_83 = arith.constant 0 : index
    %107 = vector.load %arg4[%c208, %c0_83] : memref<216x512xf32, #tpu.memory_space<vmem>>, vector<8x512xf32>
    %108 = arith.mulf %106, %107 : vector<8x512xf32>
    %c208_84 = arith.constant 208 : index
    %c0_85 = arith.constant 0 : index
    %109 = vector.load %arg6[%c208_84, %c0_85] : memref<216x512xf32, #tpu.memory_space<vmem>>, vector<8x512xf32>
    tpu.vector_store %arg6[%c208_84, %c0_85], %108 {strides = array<i32>} : memref<216x512xf32, #tpu.memory_space<vmem>>, vector<8x512xf32>,
    %c0_86 = arith.constant 0 : index
    %c0_87 = arith.constant 0 : index
    %110 = vector.load %arg6[%c0_86, %c0_87] : memref<216x512xf32, #tpu.memory_space<vmem>>, vector<216x512xf32>
    %111 = arith.truncf %110 : vector<216x512xf32> to vector<216x512xbf16>
    %cst = arith.constant dense<0.000000e+00> : vector<8x512xf32>
    %112 = tpu.matmul %2, %111, %cst {dimension_numbers = #tpu.dot_dimension_numbers<[1], [0], [0], [1], [0, 0, 1, 1], [], []>} : vector<8x216xbf16>, vector<216x512xbf16>, vector<8x512xf32> -> vector<8x512xf32>
    %cst_88 = arith.constant 0.000000e+00 : f32
    %113 = vector.broadcast %cst_88 : f32 to vector<8x512xf32>
    %114 = arith.maximumf %112, %113 : vector<8x512xf32>
    %c0_89 = arith.constant 0 : index
    %c0_90 = arith.constant 0 : index
    %115 = vector.load %arg3[%c0_89, %c0_90] : memref<8x216xbf16, #tpu.memory_space<vmem>>, vector<8x216xbf16>
    %c73_i32_91 = arith.constant 73 : i32
    %116 = tpu.dynamic_rotate %114 by %c73_i32_91 dim 1 : vector<8x512xf32>, i32 -> vector<8x512xf32>
    %c0_92 = arith.constant 0 : index
    %c0_93 = arith.constant 0 : index
    %117 = vector.load %arg4[%c0_92, %c0_93] : memref<216x512xf32, #tpu.memory_space<vmem>>, vector<8x512xf32>
    %118 = arith.mulf %116, %117 : vector<8x512xf32>
    %c0_94 = arith.constant 0 : index
    %c0_95 = arith.constant 0 : index
    %119 = vector.load %arg6[%c0_94, %c0_95] : memref<216x512xf32, #tpu.memory_space<vmem>>, vector<8x512xf32>
    tpu.vector_store %arg6[%c0_94, %c0_95], %118 {strides = array<i32>} : memref<216x512xf32, #tpu.memory_space<vmem>>, vector<8x512xf32>,
    %c72_i32_96 = arith.constant 72 : i32
    %120 = tpu.dynamic_rotate %114 by %c72_i32_96 dim 1 : vector<8x512xf32>, i32 -> vector<8x512xf32>
    %c8_97 = arith.constant 8 : index
    %c0_98 = arith.constant 0 : index
    %121 = vector.load %arg4[%c8_97, %c0_98] : memref<216x512xf32, #tpu.memory_space<vmem>>, vector<8x512xf32>
    %122 = arith.mulf %120, %121 : vector<8x512xf32>
    %c8_99 = arith.constant 8 : index
    %c0_100 = arith.constant 0 : index
    %123 = vector.load %arg6[%c8_99, %c0_100] : memref<216x512xf32, #tpu.memory_space<vmem>>, vector<8x512xf32>
    tpu.vector_store %arg6[%c8_99, %c0_100], %122 {strides = array<i32>} : memref<216x512xf32, #tpu.memory_space<vmem>>, vector<8x512xf32>,
    %c71_i32_101 = arith.constant 71 : i32
    %124 = tpu.dynamic_rotate %114 by %c71_i32_101 dim 1 : vector<8x512xf32>, i32 -> vector<8x512xf32>
    %c16_102 = arith.constant 16 : index
    %c0_103 = arith.constant 0 : index
    %125 = vector.load %arg4[%c16_102, %c0_103] : memref<216x512xf32, #tpu.memory_space<vmem>>, vector<8x512xf32>
    %126 = arith.mulf %124, %125 : vector<8x512xf32>
    %c16_104 = arith.constant 16 : index
    %c0_105 = arith.constant 0 : index
    %127 = vector.load %arg6[%c16_104, %c0_105] : memref<216x512xf32, #tpu.memory_space<vmem>>, vector<8x512xf32>
    tpu.vector_store %arg6[%c16_104, %c0_105], %126 {strides = array<i32>} : memref<216x512xf32, #tpu.memory_space<vmem>>, vector<8x512xf32>,
    %c65_i32_106 = arith.constant 65 : i32
    %128 = tpu.dynamic_rotate %114 by %c65_i32_106 dim 1 : vector<8x512xf32>, i32 -> vector<8x512xf32>
    %c24_107 = arith.constant 24 : index
    %c0_108 = arith.constant 0 : index
    %129 = vector.load %arg4[%c24_107, %c0_108] : memref<216x512xf32, #tpu.memory_space<vmem>>, vector<8x512xf32>
    %130 = arith.mulf %128, %129 : vector<8x512xf32>
    %c24_109 = arith.constant 24 : index
    %c0_110 = arith.constant 0 : index
    %131 = vector.load %arg6[%c24_109, %c0_110] : memref<216x512xf32, #tpu.memory_space<vmem>>, vector<8x512xf32>
    tpu.vector_store %arg6[%c24_109, %c0_110], %130 {strides = array<i32>} : memref<216x512xf32, #tpu.memory_space<vmem>>, vector<8x512xf32>,
    %c64_i32_111 = arith.constant 64 : i32
    %132 = tpu.dynamic_rotate %114 by %c64_i32_111 dim 1 : vector<8x512xf32>, i32 -> vector<8x512xf32>
    %c32_112 = arith.constant 32 : index
    %c0_113 = arith.constant 0 : index
    %133 = vector.load %arg4[%c32_112, %c0_113] : memref<216x512xf32, #tpu.memory_space<vmem>>, vector<8x512xf32>
    %134 = arith.mulf %132, %133 : vector<8x512xf32>
    %c32_114 = arith.constant 32 : index
    %c0_115 = arith.constant 0 : index
    %135 = vector.load %arg6[%c32_114, %c0_115] : memref<216x512xf32, #tpu.memory_space<vmem>>, vector<8x512xf32>
    tpu.vector_store %arg6[%c32_114, %c0_115], %134 {strides = array<i32>} : memref<216x512xf32, #tpu.memory_space<vmem>>, vector<8x512xf32>,
    %c63_i32_116 = arith.constant 63 : i32
    %136 = tpu.dynamic_rotate %114 by %c63_i32_116 dim 1 : vector<8x512xf32>, i32 -> vector<8x512xf32>
    %c40_117 = arith.constant 40 : index
    %c0_118 = arith.constant 0 : index
    %137 = vector.load %arg4[%c40_117, %c0_118] : memref<216x512xf32, #tpu.memory_space<vmem>>, vector<8x512xf32>
    %138 = arith.mulf %136, %137 : vector<8x512xf32>
    %c40_119 = arith.constant 40 : index
    %c0_120 = arith.constant 0 : index
    %139 = vector.load %arg6[%c40_119, %c0_120] : memref<216x512xf32, #tpu.memory_space<vmem>>, vector<8x512xf32>
    tpu.vector_store %arg6[%c40_119, %c0_120], %138 {strides = array<i32>} : memref<216x512xf32, #tpu.memory_space<vmem>>, vector<8x512xf32>,
    %c57_i32_121 = arith.constant 57 : i32
    %140 = tpu.dynamic_rotate %114 by %c57_i32_121 dim 1 : vector<8x512xf32>, i32 -> vector<8x512xf32>
    %c48_122 = arith.constant 48 : index
    %c0_123 = arith.constant 0 : index
    %141 = vector.load %arg4[%c48_122, %c0_123] : memref<216x512xf32, #tpu.memory_space<vmem>>, vector<8x512xf32>
    %142 = arith.mulf %140, %141 : vector<8x512xf32>
    %c48_124 = arith.constant 48 : index
    %c0_125 = arith.constant 0 : index
    %143 = vector.load %arg6[%c48_124, %c0_125] : memref<216x512xf32, #tpu.memory_space<vmem>>, vector<8x512xf32>
    tpu.vector_store %arg6[%c48_124, %c0_125], %142 {strides = array<i32>} : memref<216x512xf32, #tpu.memory_space<vmem>>, vector<8x512xf32>,
    %c56_i32_126 = arith.constant 56 : i32
    %144 = tpu.dynamic_rotate %114 by %c56_i32_126 dim 1 : vector<8x512xf32>, i32 -> vector<8x512xf32>
    %c56_127 = arith.constant 56 : index
    %c0_128 = arith.constant 0 : index
    %145 = vector.load %arg4[%c56_127, %c0_128] : memref<216x512xf32, #tpu.memory_space<vmem>>, vector<8x512xf32>
    %146 = arith.mulf %144, %145 : vector<8x512xf32>
    %c56_129 = arith.constant 56 : index
    %c0_130 = arith.constant 0 : index
    %147 = vector.load %arg6[%c56_129, %c0_130] : memref<216x512xf32, #tpu.memory_space<vmem>>, vector<8x512xf32>
    tpu.vector_store %arg6[%c56_129, %c0_130], %146 {strides = array<i32>} : memref<216x512xf32, #tpu.memory_space<vmem>>, vector<8x512xf32>,
    %c55_i32_131 = arith.constant 55 : i32
    %148 = tpu.dynamic_rotate %114 by %c55_i32_131 dim 1 : vector<8x512xf32>, i32 -> vector<8x512xf32>
    %c64_132 = arith.constant 64 : index
    %c0_133 = arith.constant 0 : index
    %149 = vector.load %arg4[%c64_132, %c0_133] : memref<216x512xf32, #tpu.memory_space<vmem>>, vector<8x512xf32>
    %150 = arith.mulf %148, %149 : vector<8x512xf32>
    %c64_134 = arith.constant 64 : index
    %c0_135 = arith.constant 0 : index
    %151 = vector.load %arg6[%c64_134, %c0_135] : memref<216x512xf32, #tpu.memory_space<vmem>>, vector<8x512xf32>
    tpu.vector_store %arg6[%c64_134, %c0_135], %150 {strides = array<i32>} : memref<216x512xf32, #tpu.memory_space<vmem>>, vector<8x512xf32>,
    %c9_i32_136 = arith.constant 9 : i32
    %152 = tpu.dynamic_rotate %114 by %c9_i32_136 dim 1 : vector<8x512xf32>, i32 -> vector<8x512xf32>
    %c72_137 = arith.constant 72 : index
    %c0_138 = arith.constant 0 : index
    %153 = vector.load %arg4[%c72_137, %c0_138] : memref<216x512xf32, #tpu.memory_space<vmem>>, vector<8x512xf32>
    %154 = arith.mulf %152, %153 : vector<8x512xf32>
    %c72_139 = arith.constant 72 : index
    %c0_140 = arith.constant 0 : index
    %155 = vector.load %arg6[%c72_139, %c0_140] : memref<216x512xf32, #tpu.memory_space<vmem>>, vector<8x512xf32>
    tpu.vector_store %arg6[%c72_139, %c0_140], %154 {strides = array<i32>} : memref<216x512xf32, #tpu.memory_space<vmem>>, vector<8x512xf32>,
    %c8_i32_141 = arith.constant 8 : i32
    %156 = tpu.dynamic_rotate %114 by %c8_i32_141 dim 1 : vector<8x512xf32>, i32 -> vector<8x512xf32>
    %c80_142 = arith.constant 80 : index
    %c0_143 = arith.constant 0 : index
    %157 = vector.load %arg4[%c80_142, %c0_143] : memref<216x512xf32, #tpu.memory_space<vmem>>, vector<8x512xf32>
    %158 = arith.mulf %156, %157 : vector<8x512xf32>
    %c80_144 = arith.constant 80 : index
    %c0_145 = arith.constant 0 : index
    %159 = vector.load %arg6[%c80_144, %c0_145] : memref<216x512xf32, #tpu.memory_space<vmem>>, vector<8x512xf32>
    tpu.vector_store %arg6[%c80_144, %c0_145], %158 {strides = array<i32>} : memref<216x512xf32, #tpu.memory_space<vmem>>, vector<8x512xf32>,
    %c7_i32_146 = arith.constant 7 : i32
    %160 = tpu.dynamic_rotate %114 by %c7_i32_146 dim 1 : vector<8x512xf32>, i32 -> vector<8x512xf32>
    %c88_147 = arith.constant 88 : index
    %c0_148 = arith.constant 0 : index
    %161 = vector.load %arg4[%c88_147, %c0_148] : memref<216x512xf32, #tpu.memory_space<vmem>>, vector<8x512xf32>
    %162 = arith.mulf %160, %161 : vector<8x512xf32>
    %c88_149 = arith.constant 88 : index
    %c0_150 = arith.constant 0 : index
    %163 = vector.load %arg6[%c88_149, %c0_150] : memref<216x512xf32, #tpu.memory_space<vmem>>, vector<8x512xf32>
    tpu.vector_store %arg6[%c88_149, %c0_150], %162 {strides = array<i32>} : memref<216x512xf32, #tpu.memory_space<vmem>>, vector<8x512xf32>,
    %c1_i32_151 = arith.constant 1 : i32
    %164 = tpu.dynamic_rotate %114 by %c1_i32_151 dim 1 : vector<8x512xf32>, i32 -> vector<8x512xf32>
    %c96_152 = arith.constant 96 : index
    %c0_153 = arith.constant 0 : index
    %165 = vector.load %arg4[%c96_152, %c0_153] : memref<216x512xf32, #tpu.memory_space<vmem>>, vector<8x512xf32>
    %166 = arith.mulf %164, %165 : vector<8x512xf32>
    %c96_154 = arith.constant 96 : index
    %c0_155 = arith.constant 0 : index
    %167 = vector.load %arg6[%c96_154, %c0_155] : memref<216x512xf32, #tpu.memory_space<vmem>>, vector<8x512xf32>
    tpu.vector_store %arg6[%c96_154, %c0_155], %166 {strides = array<i32>} : memref<216x512xf32, #tpu.memory_space<vmem>>, vector<8x512xf32>,
    %c104_156 = arith.constant 104 : index
    %c0_157 = arith.constant 0 : index
    %168 = vector.load %arg4[%c104_156, %c0_157] : memref<216x512xf32, #tpu.memory_space<vmem>>, vector<8x512xf32>
    %169 = arith.mulf %114, %168 : vector<8x512xf32>
    %c104_158 = arith.constant 104 : index
    %c0_159 = arith.constant 0 : index
    %170 = vector.load %arg6[%c104_158, %c0_159] : memref<216x512xf32, #tpu.memory_space<vmem>>, vector<8x512xf32>
    tpu.vector_store %arg6[%c104_158, %c0_159], %169 {strides = array<i32>} : memref<216x512xf32, #tpu.memory_space<vmem>>, vector<8x512xf32>,
    %c511_i32_160 = arith.constant 511 : i32
    %171 = tpu.dynamic_rotate %114 by %c511_i32_160 dim 1 : vector<8x512xf32>, i32 -> vector<8x512xf32>
    %c112_161 = arith.constant 112 : index
    %c0_162 = arith.constant 0 : index
    %172 = vector.load %arg4[%c112_161, %c0_162] : memref<216x512xf32, #tpu.memory_space<vmem>>, vector<8x512xf32>
    %173 = arith.mulf %171, %172 : vector<8x512xf32>
    %c112_163 = arith.constant 112 : index
    %c0_164 = arith.constant 0 : index
    %174 = vector.load %arg6[%c112_163, %c0_164] : memref<216x512xf32, #tpu.memory_space<vmem>>, vector<8x512xf32>
    tpu.vector_store %arg6[%c112_163, %c0_164], %173 {strides = array<i32>} : memref<216x512xf32, #tpu.memory_space<vmem>>, vector<8x512xf32>,
    %c505_i32_165 = arith.constant 505 : i32
    %175 = tpu.dynamic_rotate %114 by %c505_i32_165 dim 1 : vector<8x512xf32>, i32 -> vector<8x512xf32>
    %c120_166 = arith.constant 120 : index
    %c0_167 = arith.constant 0 : index
    %176 = vector.load %arg4[%c120_166, %c0_167] : memref<216x512xf32, #tpu.memory_space<vmem>>, vector<8x512xf32>
    %177 = arith.mulf %175, %176 : vector<8x512xf32>
    %c120_168 = arith.constant 120 : index
    %c0_169 = arith.constant 0 : index
    %178 = vector.load %arg6[%c120_168, %c0_169] : memref<216x512xf32, #tpu.memory_space<vmem>>, vector<8x512xf32>
    tpu.vector_store %arg6[%c120_168, %c0_169], %177 {strides = array<i32>} : memref<216x512xf32, #tpu.memory_space<vmem>>, vector<8x512xf32>,
    %c504_i32_170 = arith.constant 504 : i32
    %179 = tpu.dynamic_rotate %114 by %c504_i32_170 dim 1 : vector<8x512xf32>, i32 -> vector<8x512xf32>
    %c128_171 = arith.constant 128 : index
    %c0_172 = arith.constant 0 : index
    %180 = vector.load %arg4[%c128_171, %c0_172] : memref<216x512xf32, #tpu.memory_space<vmem>>, vector<8x512xf32>
    %181 = arith.mulf %179, %180 : vector<8x512xf32>
    %c128_173 = arith.constant 128 : index
    %c0_174 = arith.constant 0 : index
    %182 = vector.load %arg6[%c128_173, %c0_174] : memref<216x512xf32, #tpu.memory_space<vmem>>, vector<8x512xf32>
    tpu.vector_store %arg6[%c128_173, %c0_174], %181 {strides = array<i32>} : memref<216x512xf32, #tpu.memory_space<vmem>>, vector<8x512xf32>,
    %c503_i32_175 = arith.constant 503 : i32
    %183 = tpu.dynamic_rotate %114 by %c503_i32_175 dim 1 : vector<8x512xf32>, i32 -> vector<8x512xf32>
    %c136_176 = arith.constant 136 : index
    %c0_177 = arith.constant 0 : index
    %184 = vector.load %arg4[%c136_176, %c0_177] : memref<216x512xf32, #tpu.memory_space<vmem>>, vector<8x512xf32>
    %185 = arith.mulf %183, %184 : vector<8x512xf32>
    %c136_178 = arith.constant 136 : index
    %c0_179 = arith.constant 0 : index
    %186 = vector.load %arg6[%c136_178, %c0_179] : memref<216x512xf32, #tpu.memory_space<vmem>>, vector<8x512xf32>
    tpu.vector_store %arg6[%c136_178, %c0_179], %185 {strides = array<i32>} : memref<216x512xf32, #tpu.memory_space<vmem>>, vector<8x512xf32>,
    %c457_i32_180 = arith.constant 457 : i32
    %187 = tpu.dynamic_rotate %114 by %c457_i32_180 dim 1 : vector<8x512xf32>, i32 -> vector<8x512xf32>
    %c144_181 = arith.constant 144 : index
    %c0_182 = arith.constant 0 : index
    %188 = vector.load %arg4[%c144_181, %c0_182] : memref<216x512xf32, #tpu.memory_space<vmem>>, vector<8x512xf32>
    %189 = arith.mulf %187, %188 : vector<8x512xf32>
    %c144_183 = arith.constant 144 : index
    %c0_184 = arith.constant 0 : index
    %190 = vector.load %arg6[%c144_183, %c0_184] : memref<216x512xf32, #tpu.memory_space<vmem>>, vector<8x512xf32>
    tpu.vector_store %arg6[%c144_183, %c0_184], %189 {strides = array<i32>} : memref<216x512xf32, #tpu.memory_space<vmem>>, vector<8x512xf32>,
    %c456_i32_185 = arith.constant 456 : i32
    %191 = tpu.dynamic_rotate %114 by %c456_i32_185 dim 1 : vector<8x512xf32>, i32 -> vector<8x512xf32>
    %c152_186 = arith.constant 152 : index
    %c0_187 = arith.constant 0 : index
    %192 = vector.load %arg4[%c152_186, %c0_187] : memref<216x512xf32, #tpu.memory_space<vmem>>, vector<8x512xf32>
    %193 = arith.mulf %191, %192 : vector<8x512xf32>
    %c152_188 = arith.constant 152 : index
    %c0_189 = arith.constant 0 : index
    %194 = vector.load %arg6[%c152_188, %c0_189] : memref<216x512xf32, #tpu.memory_space<vmem>>, vector<8x512xf32>
    tpu.vector_store %arg6[%c152_188, %c0_189], %193 {strides = array<i32>} : memref<216x512xf32, #tpu.memory_space<vmem>>, vector<8x512xf32>,
    %c455_i32_190 = arith.constant 455 : i32
    %195 = tpu.dynamic_rotate %114 by %c455_i32_190 dim 1 : vector<8x512xf32>, i32 -> vector<8x512xf32>
    %c160_191 = arith.constant 160 : index
    %c0_192 = arith.constant 0 : index
    %196 = vector.load %arg4[%c160_191, %c0_192] : memref<216x512xf32, #tpu.memory_space<vmem>>, vector<8x512xf32>
    %197 = arith.mulf %195, %196 : vector<8x512xf32>
    %c160_193 = arith.constant 160 : index
    %c0_194 = arith.constant 0 : index
    %198 = vector.load %arg6[%c160_193, %c0_194] : memref<216x512xf32, #tpu.memory_space<vmem>>, vector<8x512xf32>
    tpu.vector_store %arg6[%c160_193, %c0_194], %197 {strides = array<i32>} : memref<216x512xf32, #tpu.memory_space<vmem>>, vector<8x512xf32>,
    %c449_i32_195 = arith.constant 449 : i32
    %199 = tpu.dynamic_rotate %114 by %c449_i32_195 dim 1 : vector<8x512xf32>, i32 -> vector<8x512xf32>
    %c168_196 = arith.constant 168 : index
    %c0_197 = arith.constant 0 : index
    %200 = vector.load %arg4[%c168_196, %c0_197] : memref<216x512xf32, #tpu.memory_space<vmem>>, vector<8x512xf32>
    %201 = arith.mulf %199, %200 : vector<8x512xf32>
    %c168_198 = arith.constant 168 : index
    %c0_199 = arith.constant 0 : index
    %202 = vector.load %arg6[%c168_198, %c0_199] : memref<216x512xf32, #tpu.memory_space<vmem>>, vector<8x512xf32>
    tpu.vector_store %arg6[%c168_198, %c0_199], %201 {strides = array<i32>} : memref<216x512xf32, #tpu.memory_space<vmem>>, vector<8x512xf32>,
    %c448_i32_200 = arith.constant 448 : i32
    %203 = tpu.dynamic_rotate %114 by %c448_i32_200 dim 1 : vector<8x512xf32>, i32 -> vector<8x512xf32>
    %c176_201 = arith.constant 176 : index
    %c0_202 = arith.constant 0 : index
    %204 = vector.load %arg4[%c176_201, %c0_202] : memref<216x512xf32, #tpu.memory_space<vmem>>, vector<8x512xf32>
    %205 = arith.mulf %203, %204 : vector<8x512xf32>
    %c176_203 = arith.constant 176 : index
    %c0_204 = arith.constant 0 : index
    %206 = vector.load %arg6[%c176_203, %c0_204] : memref<216x512xf32, #tpu.memory_space<vmem>>, vector<8x512xf32>
    tpu.vector_store %arg6[%c176_203, %c0_204], %205 {strides = array<i32>} : memref<216x512xf32, #tpu.memory_space<vmem>>, vector<8x512xf32>,
    %c447_i32_205 = arith.constant 447 : i32
    %207 = tpu.dynamic_rotate %114 by %c447_i32_205 dim 1 : vector<8x512xf32>, i32 -> vector<8x512xf32>
    %c184_206 = arith.constant 184 : index
    %c0_207 = arith.constant 0 : index
    %208 = vector.load %arg4[%c184_206, %c0_207] : memref<216x512xf32, #tpu.memory_space<vmem>>, vector<8x512xf32>
    %209 = arith.mulf %207, %208 : vector<8x512xf32>
    %c184_208 = arith.constant 184 : index
    %c0_209 = arith.constant 0 : index
    %210 = vector.load %arg6[%c184_208, %c0_209] : memref<216x512xf32, #tpu.memory_space<vmem>>, vector<8x512xf32>
    tpu.vector_store %arg6[%c184_208, %c0_209], %209 {strides = array<i32>} : memref<216x512xf32, #tpu.memory_space<vmem>>, vector<8x512xf32>,
    %c441_i32_210 = arith.constant 441 : i32
    %211 = tpu.dynamic_rotate %114 by %c441_i32_210 dim 1 : vector<8x512xf32>, i32 -> vector<8x512xf32>
    %c192_211 = arith.constant 192 : index
    %c0_212 = arith.constant 0 : index
    %212 = vector.load %arg4[%c192_211, %c0_212] : memref<216x512xf32, #tpu.memory_space<vmem>>, vector<8x512xf32>
    %213 = arith.mulf %211, %212 : vector<8x512xf32>
    %c192_213 = arith.constant 192 : index
    %c0_214 = arith.constant 0 : index
    %214 = vector.load %arg6[%c192_213, %c0_214] : memref<216x512xf32, #tpu.memory_space<vmem>>, vector<8x512xf32>
    tpu.vector_store %arg6[%c192_213, %c0_214], %213 {strides = array<i32>} : memref<216x512xf32, #tpu.memory_space<vmem>>, vector<8x512xf32>,
    %c440_i32_215 = arith.constant 440 : i32
    %215 = tpu.dynamic_rotate %114 by %c440_i32_215 dim 1 : vector<8x512xf32>, i32 -> vector<8x512xf32>
    %c200_216 = arith.constant 200 : index
    %c0_217 = arith.constant 0 : index
    %216 = vector.load %arg4[%c200_216, %c0_217] : memref<216x512xf32, #tpu.memory_space<vmem>>, vector<8x512xf32>
    %217 = arith.mulf %215, %216 : vector<8x512xf32>
    %c200_218 = arith.constant 200 : index
    %c0_219 = arith.constant 0 : index
    %218 = vector.load %arg6[%c200_218, %c0_219] : memref<216x512xf32, #tpu.memory_space<vmem>>, vector<8x512xf32>
    tpu.vector_store %arg6[%c200_218, %c0_219], %217 {strides = array<i32>} : memref<216x512xf32, #tpu.memory_space<vmem>>, vector<8x512xf32>,
    %c439_i32_220 = arith.constant 439 : i32
    %219 = tpu.dynamic_rotate %114 by %c439_i32_220 dim 1 : vector<8x512xf32>, i32 -> vector<8x512xf32>
    %c208_221 = arith.constant 208 : index
    %c0_222 = arith.constant 0 : index
    %220 = vector.load %arg4[%c208_221, %c0_222] : memref<216x512xf32, #tpu.memory_space<vmem>>, vector<8x512xf32>
    %221 = arith.mulf %219, %220 : vector<8x512xf32>
    %c208_223 = arith.constant 208 : index
    %c0_224 = arith.constant 0 : index
    %222 = vector.load %arg6[%c208_223, %c0_224] : memref<216x512xf32, #tpu.memory_space<vmem>>, vector<8x512xf32>
    tpu.vector_store %arg6[%c208_223, %c0_224], %221 {strides = array<i32>} : memref<216x512xf32, #tpu.memory_space<vmem>>, vector<8x512xf32>,
    %c0_225 = arith.constant 0 : index
    %c0_226 = arith.constant 0 : index
    %223 = vector.load %arg6[%c0_225, %c0_226] : memref<216x512xf32, #tpu.memory_space<vmem>>, vector<216x512xf32>
    %224 = arith.truncf %223 : vector<216x512xf32> to vector<216x512xbf16>
    %cst_227 = arith.constant dense<0.000000e+00> : vector<8x512xf32>
    %225 = tpu.matmul %115, %224, %cst_227 {dimension_numbers = #tpu.dot_dimension_numbers<[1], [0], [0], [1], [0, 0, 1, 1], [], []>} : vector<8x216xbf16>, vector<216x512xbf16>, vector<8x512xf32> -> vector<8x512xf32>
    %c0_228 = arith.constant 0 : index
    %c0_229 = arith.constant 0 : index
    %c0_230 = arith.constant 0 : index
    %226 = vector.load %arg1[%c0_228, %c0_229, %c0_230] : memref<1x8x512xf32, #tpu.memory_space<vmem>>, vector<1x8x512xf32>
    %227 = vector.shape_cast %226 : vector<1x8x512xf32> to vector<8x512xf32>
    %228 = arith.addf %225, %227 : vector<8x512xf32>
    %cst_231 = arith.constant 0.000000e+00 : f32
    %229 = vector.broadcast %cst_231 : f32 to vector<8x512xf32>
    %230 = arith.maximumf %228, %229 : vector<8x512xf32>
    %c0_232 = arith.constant 0 : index
    %c0_233 = arith.constant 0 : index
    %c0_234 = arith.constant 0 : index
    %231 = vector.load %arg5[%c0_232, %c0_233, %c0_234] : memref<1x8x512xf32, #tpu.memory_space<vmem>>, vector<1x8x512xf32>
    %232 = vector.shape_cast %231 : vector<1x8x512xf32> to vector<8x512xf32>
    %233 = vector.shape_cast %230 : vector<8x512xf32> to vector<1x8x512xf32>
    tpu.vector_store %arg5[%c0_232, %c0_233, %c0_234], %233 {strides = array<i32>} : memref<1x8x512xf32, #tpu.memory_space<vmem>>, vector<1x8x512xf32>,
    return
  }
  func.func @transform_0(%arg0: i32) -> (i32, i32, i32) {
    %c0_i32 = arith.constant 0 : i32
    %c0_i32_0 = arith.constant 0 : i32
    %c0_i32_1 = arith.constant 0 : i32
    return %arg0, %c0_i32, %c0_i32_0 : i32, i32, i32
  }
  func.func @transform_1(%arg0: i32) -> (i32, i32) {
    %c0_i32 = arith.constant 0 : i32
    %c0_i32_0 = arith.constant 0 : i32
    %c0_i32_1 = arith.constant 0 : i32
    return %c0_i32, %c0_i32_0 : i32, i32
  }
  func.func @transform_2(%arg0: i32) -> (i32, i32) {
    %c0_i32 = arith.constant 0 : i32
    %c0_i32_0 = arith.constant 0 : i32
    %c0_i32_1 = arith.constant 0 : i32
    return %c0_i32, %c0_i32_0 : i32, i32
  }
  func.func @transform_3(%arg0: i32) -> (i32, i32) {
    %c0_i32 = arith.constant 0 : i32
    %c0_i32_0 = arith.constant 0 : i32
    %c0_i32_1 = arith.constant 0 : i32
    return %c0_i32, %c0_i32_0 : i32, i32
  }
  func.func @transform_4(%arg0: i32) -> (i32, i32, i32) {
    %c0_i32 = arith.constant 0 : i32
    %c0_i32_0 = arith.constant 0 : i32
    %c0_i32_1 = arith.constant 0 : i32
    return %arg0, %c0_i32, %c0_i32_0 : i32, i32, i32
  }
}

</mosaic_0001>

<bundles_post_ra>
// kernel: tpu_custom_call.1
= control target key start
LH: loop header
LB: loop body
LE: loop exit
PB: predicated region body
PF: predicated region fallthrough
CT: control target
= control target key end

     0   :  { %9 = vsyncpa [#allocation4], 0  ;;  %s3574_s0 = inlined_call_operand.hbm [shape: f32[2,8,512], index: 0, kind: input, shape index: {}]   ;;  %s3575_s1 = inlined_call_operand.hbm [shape: bf16[8,216], index: 1, kind: input, shape index: {}]   ;;  %s3576_s2 = inlined_call_operand.hbm [shape: bf16[8,216], index: 2, kind: input, shape index: {}]   ;;  %s3577_s3 = inlined_call_operand.hbm [shape: f32[216,512], index: 3, kind: input, shape index: {}]   ;;  %s3578_s4 = inlined_call_operand.hbm [shape: f32[2,8,512], index: 4, kind: output, shape index: {}]  }
   0x1   :  { %11 = vsyncpa [#allocation4 + $0x1], 0 }
   0x2   :  { %12 = vsyncpa [#allocation7], 0 }
   0x3   :  { %13 = vsyncpa [#allocation10], 0 }
   0x4   :  { %14 = vsyncpa [#allocation5], 0 }
   0x5   :  { %16 = vsyncpa [#allocation5 + $0x1], 0  ;;  %s2378_s15 = smov 0   ;;  %s2380_s16 = smov 0  }
   0x6   :  { %s2382_s17 = smov 0   ;;  %s2384_s18 = smov 0  }
   0x7 LB: > { %s2399_s19 = sadd.s32 4294967295, %s2327_s18   ;;  %s2002_s20 = sadd.s32 4294967294, %s2327_s18   ;;  %s2327_s18 = sphi %s2384_s18, %s3698_s18   ;;  %s2323_s17 = sphi %s2382_s17, %s3697_s17   ;;  %s2319_s16 = sphi %s2380_s16, %s3696_s16   ;;  %s2315_s15 = sphi %s2378_s15, %s3695_s15  }
   0x8   : > { %p42_p0 = scmp.ne.s32.totalorder %s2319_s16, %s2315_s15  ;;  %p3579_p1 = scmp.eq.s32.totalorder %s2399_s19, 0 }
   0x9   : > { %p135_p3 = scmp.eq.s32.totalorder %s2002_s20, 1  ;;  %p2003_p5 = scmp.ge.s32.totalorder %s2327_s18, 1 }
   0xa   : > { %p2408_p4 = por %p3579_p1, %p42_p0  ;;  %p142_p7 = scmp.lt.s32.totalorder %s2327_s18, 3 }
   0xb   : > { %p2413_p6 = por %p135_p3, %p42_p0  ;;  %s2329_s24 = smov [#allocation6]  }
   0xc   : > { %s3604_s21 = scalar_select %p2408_p4, 1, 0 }
   0xd   : > { %s3605_s22 = scalar_select %p2413_p6, 1, 0 }
   0xe   : > { %p2418_p8 = pnand %p2003_p5, %p142_p7  ;;  %s155_s25 = sshll.u32 %s2329_s24, 4  ;;  %s156_s25 = int_to_ptr.vmem [resolvable:$true] %s155_s25 }
   0xf   : > { %s2330_s26 = smov [#allocation8]   ;;  %s2331_s29 = smov [#allocation9]  }
  0x10   : > { %s3606_s23 = scalar_select %p2418_p8, 1, 0 }
  0x11   : > { %p2052_p10 = pneg %p2418_p8  ;;  %s166_s27 = sshll.u32 %s2330_s26, 4  ;;  %s2431_s27 = int_to_ptr.vmem [resolvable:$true] %s166_s27 }
  0x12   : > { %s176_s30 = sshll.u32 %s2331_s29, 4  ;;  %s2139_s7 = scalar_lea.hbm %s3575_s1, 128  ;;  %s2433_s30 = int_to_ptr.vmem [resolvable:$true] %s176_s30 }
  0x13   : > { %p2427_p11 = pnand %p2052_p10, %p3579_p1  ;;  %p2140_p12 = scmp.ne.s32.totalorder %s3575_s1, %s2139_s7 }
  0x14   : > { %p2146_p5 = scmp.lt.u32.totalorder %s2139_s7, %s3575_s1 }
  0x15   : > { %p2443_p13 = pneg %p2427_p11 }
  0x17   : > { %p2142_p0 = pnand %p2443_p13, %p2140_p12 }
  0x19   : > { %p2143_p3 = pneg %p2142_p0 }
  0x1b   : > { %p2148_p7 = pnand %p2146_p5, %p2143_p3 }
  0x1d   : > { %2151 = shalt.err (!%p2148_p7)
}
  0x1e   : > { %s2152_s13 = scalar_lea.vmem %s156_s25, 128  ;;  %p2160_p2 = scmp.lt.s32.totalorder %s156_s25, %s156_s25 }
  0x1f   : > { %p2153_p10 = scmp.ne.s32.totalorder %s156_s25, %s2152_s13  ;;  %p2161_p6 = scmp.lt.s32.totalorder %s2152_s13, %s2152_s13 }
  0x21   : > { %p2155_p9 = pnand %p2153_p10, %p2443_p13  ;;  %p2162_p4 = por %p2161_p6, %p2160_p2 }
  0x23   : > { %p2156_p1 = pneg %p2155_p9 }
  0x25   : > { %p2163_p8 = pnand %p2162_p4, %p2156_p1 }
  0x27   : > { %2166 = shalt.err (!%p2163_p8)
}
  0x28   : > { %2055 = dma.hbm_to_vmem [thread:$0]  (!%p2427_p11), %s3575_s1, 128, %s156_s25, [#allocation7]  }
  0x29   : > { %s2167_s29 = scalar_lea.hbm %s3576_s2, 128 }
  0x2a   : > { %p2168_p9 = scmp.ne.s32.totalorder %s3576_s2, %s2167_s29  ;;  %p2174_p1 = scmp.lt.u32.totalorder %s2167_s29, %s3576_s2 }
  0x2c   : > { %p2170_p12 = pnand %p2168_p9, %p2443_p13 }
  0x2e   : > { %p2171_p2 = pneg %p2170_p12 }
  0x30   : > { %p2176_p4 = pnand %p2174_p1, %p2171_p2 }
  0x32   : > { %2179 = shalt.err (!%p2176_p4)
}
  0x33   : > { %s2180_s25 = scalar_lea.vmem %s2431_s27, 128  ;;  %p2188_p3 = scmp.lt.s32.totalorder %s2431_s27, %s2431_s27 }
  0x34   : > { %p2181_p6 = scmp.ne.s32.totalorder %s2431_s27, %s2180_s25  ;;  %p2189_p5 = scmp.lt.s32.totalorder %s2180_s25, %s2180_s25 }
  0x36   : > { %p2183_p8 = pnand %p2181_p6, %p2443_p13  ;;  %p2190_p7 = por %p2189_p5, %p2188_p3 }
  0x38   : > { %p2184_p0 = pneg %p2183_p8 }
  0x3a   : > { %p2191_p10 = pnand %p2190_p7, %p2184_p0 }
  0x3c   : > { %2194 = shalt.err (!%p2191_p10)
}
  0x3d   : > { %2058 = dma.hbm_to_vmem [thread:$0]  (!%p2427_p11), %s3576_s2, 128, %s2431_s27, [#allocation7]  }
  0x3e   : > { %s2195_s14 = scalar_lea.hbm %s3577_s3, 13824 }
  0x3f   : > { %p2196_p9 = scmp.ne.s32.totalorder %s3577_s3, %s2195_s14  ;;  %p2202_p1 = scmp.lt.u32.totalorder %s2195_s14, %s3577_s3 }
  0x41   : > { %p2198_p12 = pnand %p2196_p9, %p2443_p13 }
  0x43   : > { %p2199_p2 = pneg %p2198_p12 }
  0x45   : > { %p2204_p4 = pnand %p2202_p1, %p2199_p2 }
  0x47   : > { %2207 = shalt.err (!%p2204_p4)
}
  0x48   : > { %s2208_s27 = scalar_lea.vmem %s2433_s30, 13824  ;;  %p2216_p3 = scmp.lt.s32.totalorder %s2433_s30, %s2433_s30 }
  0x49   : > { %p2209_p6 = scmp.ne.s32.totalorder %s2433_s30, %s2208_s27  ;;  %p2217_p5 = scmp.lt.s32.totalorder %s2208_s27, %s2208_s27 }
  0x4b   : > { %p2211_p8 = pnand %p2209_p6, %p2443_p13  ;;  %p2218_p7 = por %p2217_p5, %p2216_p3 }
  0x4d   : > { %p2212_p0 = pneg %p2211_p8 }
  0x4f   : > { %p2219_p10 = pnand %p2218_p7, %p2212_p0 }
  0x51   : > { %2222 = shalt.err (!%p2219_p10)
}
  0x52   : > { %s2332_s5 = smov 512   ;;  %s2333_s10 = smov 32  }
  0x53   : > { %2061 = dma.hbm_to_vmem [thread:$0]  (!%p2427_p11), %s3577_s3, 13824, %s2433_s30, [#allocation10], %s2332_s5, %s2332_s5, %s2333_s10  }
  0x54   : > { %s2506_s8 = sadd.s32 1, %s2327_s18   ;;  %s29_s9 = sadd.s32 1, %s2323_s17 }
  0x55   : > { %s26_s25 = ssub.s32 %s2327_s18, %s2506_s8  ;;  %p36_p9 = scmp.ne.s32.totalorder %s2323_s17, %s2319_s16 }
  0x56   : > { %p27_p13 = scmp.eq.s32.totalorder %s26_s25, 0  ;;  %p37_p12 = scmp.eq.s32.totalorder %s2327_s18, 0 }
  0x57   : > { %p2073_p2 = scmp.lt.s32.totalorder %s2327_s18, 2  ;;  %p3609_p4 = scmp.eq.s32.totalorder %s2399_s19, 1 }
  0x58   : > { %s2516_s11 = scalar_select %p27_p13, %s2323_s17, %s29_s9  }
  0x59   : > { %p38_p1 = por %p37_p12, %p36_p9  ;;  %p2520_p6 = por %p3609_p4, %p36_p9 }
  0x5a   : > { %s190_s28 = sand.u32 1, %s2323_s17   ;;  %s2034_s13 = sshll.u32 %s2327_s18, 9 }
  0x5b   : > { %s2008_s30 = sshll.u32 %s190_s28, 5  ;;  %s2529_s24 = scalar_lea.hbm %s3574_s0, %s2034_s13 }
  0x5c   : > { %s194_s26 = scalar_lea.vmem [#allocation3], %s2008_s30  ;;  %p2531_p11 = pnand %p2073_p2, %p38_p1 }
  0x5d   : > { %s202_s29 = sshll.u32 %s194_s26, 4  ;;  %s191_s5 = scalar_lea.sflag [#allocation4], %s190_s28  ;;  %s2535_s29 = int_to_ptr.vmem [resolvable:$true] %s202_s29 }
  0x5e   : > { %s2223_s10 = scalar_lea.hbm %s2529_s24, 512  ;;  %p2225_p0 = pneg %p2531_p11 }
  0x5f   : > { %p2224_p8 = scmp.ne.s32.totalorder %s2529_s24, %s2223_s10  ;;  %s2228_s25 = scalar_lea.hbm %s3574_s0, 1024 }
  0x60   : > { %p2229_p7 = scmp.lt.u32.totalorder %s2529_s24, %s3574_s0  ;;  %p2230_p10 = scmp.lt.u32.totalorder %s2228_s25, %s2223_s10 }
  0x61   : > { %p2226_p3 = pnand %p2225_p0, %p2224_p8  ;;  %p2232_p9 = scmp.lt.u32.totalorder %s2223_s10, %s2529_s24 }
  0x62   : > { %p2231_p13 = por %p2230_p10, %p2229_p7 }
  0x63   : > { %p2227_p5 = pneg %p2226_p3 }
  0x64   : > { %p2233_p12 = por %p2232_p9, %p2231_p13 }
  0x66   : > { %p2234_p2 = pnand %p2233_p12, %p2227_p5 }
  0x68   : > { %2237 = shalt.err (!%p2234_p2)
}
  0x69   : > { %s2238_s28 = scalar_lea.vmem %s2535_s29, 512  ;;  %s2334_s30 = smov [#allocation3]  }
  0x6a   : > { %p2239_p1 = scmp.ne.s32.totalorder %s2535_s29, %s2238_s28  ;;  %s2243_s14 = sshll.u32 %s2334_s30, 4  ;;  %s2244_s14 = int_to_ptr.vmem [resolvable:$false] %s2243_s14 }
  0x6b   : > { %s2245_s20 = scalar_lea.vmem %s2244_s14, 1024  ;;  %p2246_p3 = scmp.lt.s32.totalorder %s2535_s29, %s2244_s14 }
  0x6c   : > { %p2241_p4 = pnand %p2239_p1, %p2225_p0  ;;  %p2247_p7 = scmp.lt.s32.totalorder %s2245_s20, %s2238_s28 }
  0x6e   : > { %p2242_p8 = pneg %p2241_p4  ;;  %p2248_p10 = por %p2247_p7, %p2246_p3 }
  0x70   : > { %p2249_p13 = pnand %p2248_p10, %p2242_p8 }
  0x72   : > { %2252 = shalt.err (!%p2249_p13)
}
  0x73   : > { %2065 = dma.hbm_to_vmem [thread:$0]  (!%p2531_p11), %s2529_s24, 512, %s2535_s29, %s191_s5  }
  0x74   : > { %p3612_p5 = scmp.ne.s32.totalorder %s3606_s23, 0 }
  0x76   : > { %211 = sbr.rel (%p3612_p5) target bundleno = 1135 (0x46f), region = 36 }
  0x7d   : > { %s2565_s26 = sand.u32 1, %s2319_s16   ;;  %p3613_p0 = scmp.ne.s32.totalorder %s3604_s21, 0 }
  0x7e   : > { %s3582_s10 = sshll.u32 %s2565_s26, 5  ;;  %s214_s6 = scalar_lea.sflag [#allocation4], %s2565_s26 }
  0x7f   : > { %s2571_s7 = scalar_lea.vmem [#allocation3], %s3582_s10 }
  0x80   : > { %2298 = dma.done.wait (%p3613_p0), %s214_s6, 512  }
  0x81   : > { %2300 = vsyncadd (%p3613_p0), %s214_s6, 4294966784  ;;  %p3614_p11 = scmp.eq.s32.totalorder %s2399_s19, 0 }
  0x83   : > { %2302 = dma.done.wait (%p3614_p11), [#allocation7], 256   ;;  %p3615_p9 = pmov %p3614_p11 }
  0x85   : > { %2304 = vsyncadd (%p3615_p9), [#allocation7], 4294967040  ;;  %p3616_p12 = pmov %p3615_p9 }
  0x86   : > { %p3617_p2 = pmov %p3615_p9 }
  0x87   : > { %2306 = dma.done.wait (%p3616_p12), [#allocation10], 13824  }
  0x88   : > { %2308 = vsyncadd (%p3617_p2), [#allocation10], 4294953472  ;;  %v2586_v0 = vld [vmem:[%s2571_s7 + $0x10] sm:$0xff]  ;;  %v2589_v1 = vld [vmem:[%s2571_s7] sm:$0xff]  ;;  %s2335_s21 = smov 73   ;;  %s2336_s23 = smov 72   ;;  %v268_v4 = vlaneseq }
  0x89   : > { %264 = vrot.lane.b32.xlu1 %v2586_v0, %s2335_s21  ;;  %260 = vrot.lane.b32.xlu0 %v2589_v1, %s2335_s21  ;;  %v2596_v2 = vld [vmem:[%s2571_s7 + $0x18] sm:$0xff]  ;;  %v2599_v3 = vld [vmem:[%s2571_s7 + $0x8] sm:$0xff]  ;;  %s2337_s24 = smov 71   ;;  %s2338_s29 = smov 65   ;;  %v699_v13 = vld [vmem:[#allocation9 + $0x240] sm:$0xff]  ;;  %vm977_vm4 = vcmask 719872  }
  0x8a   : > { %s2339_s27 = smov 64   ;;  %s2340_s5 = smov 63   ;;  %v2713_v5 = vand.u32 127, %v268_v4  ;;  %v276_v11 = vld [vmem:[#allocation9 + $0x8] sm:$0xff]  ;;  %v711_v14 = vld [vmem:[#allocation9 + $0x260] sm:$0xff]  ;;  %v702_v15 = vld [vmem:[#allocation9 + $0x258] sm:$0xff] }
  0x8b   : > { %s2341_s25 = smov 57   ;;  %s2342_s9 = smov 56   ;;  %v301_v12 = vld [vmem:[#allocation9 + $0x28] sm:$0xff]  ;;  %v275_v23 = vld [vmem:[#allocation9] sm:$0xff]  ;;  %v278_v25 = vld [vmem:[#allocation9 + $0x18] sm:$0xff] }
  0x8c   : > { %s2343_s13 = smov 55   ;;  %s2344_s28 = smov 9   ;;  %vm270_vm0 = vcmp.lt.s32.totalorder %v2713_v5, 73  ;;  %vm295_vm1 = vcmp.lt.s32.totalorder %v2713_v5, 72  ;;  %v700_v17 = vld [vmem:[#allocation9 + $0x248] sm:$0xff]  ;;  %v714_v26 = vld [vmem:[#allocation9 + $0x278] sm:$0xff] }
  0x8d   : > { %266 = vrot.lane.b32.xlu1 %v2596_v2, %s2335_s21  ;;  %262 = vrot.lane.b32.xlu0 %v2599_v3, %s2335_s21  ;;  %s2345_s30 = smov 8   ;;  %s2346_s14 = smov 7   ;;  %v701_v30 = vld [vmem:[#allocation9 + $0x250] sm:$0xff]  ;;  %v712_v33 = vld [vmem:[#allocation9 + $0x268] sm:$0xff]  ;;  %v300_v34 = vld [vmem:[#allocation9 + $0x20] sm:$0xff]  ;;  %vm320_vm2 = vcmp.lt.s32.totalorder %v2713_v5, 71 }
  0x8e   : > { %s2347_s20 = smov 1   ;;  %s3583_s6 = smov 127   ;;  %v303_v35 = vld [vmem:[#allocation9 + $0x38] sm:$0xff]  ;;  %v713_v41 = vld [vmem:[#allocation9 + $0x270] sm:$0xff]  ;;  %vm345_vm3 = vcmp.lt.s32.totalorder %v2713_v5, 65  ;;  %vm370_vm5 = vcmp.lt.s32.totalorder %v2713_v5, 64 }
  0x8f   : > { %s2349_s10 = smov 121   ;;  %v277_v42 = vld [vmem:[#allocation9 + $0x10] sm:$0xff]  ;;  %vm395_vm6 = vcmp.lt.s32.totalorder %v2713_v5, 63  ;;  %vm420_vm7 = vcmp.lt.s32.totalorder %v2713_v5, 57  ;;  %vm445_vm8 = vcmp.lt.s32.totalorder %v2713_v5, 56  ;;  %vm470_vm9 = vcmp.lt.s32.totalorder %v2713_v5, 55 }
  0x90   : > { %v302_v43 = vld [vmem:[#allocation9 + $0x30] sm:$0xff]  ;;  %vm495_vm10 = vcmp.lt.s32.totalorder %v2713_v5, 9  ;;  %vm520_vm11 = vcmp.lt.s32.totalorder %v2713_v5, 8  ;;  %vm545_vm12 = vcmp.lt.s32.totalorder %v2713_v5, 7  ;;  %vm570_vm13 = vcmp.lt.s32.totalorder %v2713_v5, 1 }
  0x91   : > { %289 = vrot.lane.b32.xlu1 %v2599_v3, %s2336_s23  ;;  %287 = vrot.lane.b32.xlu0 %v2589_v1, %s2336_s23  ;;  %vm3594_vm14 = vcmp.lt.s32.totalorder %v2713_v5, 121  ;;  %vm3593_vm15 = vcmp.lt.s32.totalorder %v2713_v5, 127 }
  0x95   : > { %293 = vrot.lane.b32.xlu1 %v2596_v2, %s2336_s23  ;;  %291 = vrot.lane.b32.xlu0 %v2586_v0, %s2336_s23 }
  0x99   : > { %314 = vrot.lane.b32.xlu1 %v2599_v3, %s2337_s24  ;;  %312 = vrot.lane.b32.xlu0 %v2589_v1, %s2337_s24 }
  0x9d   : > { %318 = vrot.lane.b32.xlu1 %v2596_v2, %s2337_s24  ;;  %316 = vrot.lane.b32.xlu0 %v2586_v0, %s2337_s24 }
  0xa1   : > { %339 = vrot.lane.b32.xlu1 %v2599_v3, %s2338_s29  ;;  %337 = vrot.lane.b32.xlu0 %v2589_v1, %s2338_s29 }
  0xa5   : > { %343 = vrot.lane.b32.xlu1 %v2596_v2, %s2338_s29  ;;  %341 = vrot.lane.b32.xlu0 %v2586_v0, %s2338_s29 }
  0xa9   : > { %364 = vrot.lane.b32.xlu1 %v2599_v3, %s2339_s27  ;;  %362 = vrot.lane.b32.xlu0 %v2589_v1, %s2339_s27 }
  0xad   : > { %368 = vrot.lane.b32.xlu1 %v2596_v2, %s2339_s27  ;;  %366 = vrot.lane.b32.xlu0 %v2586_v0, %s2339_s27 }
  0xb1   : > { %389 = vrot.lane.b32.xlu1 %v2599_v3, %s2340_s5  ;;  %387 = vrot.lane.b32.xlu0 %v2589_v1, %s2340_s5 }
  0xb5   : > { %393 = vrot.lane.b32.xlu1 %v2596_v2, %s2340_s5  ;;  %391 = vrot.lane.b32.xlu0 %v2586_v0, %s2340_s5 }
  0xb9   : > { %414 = vrot.lane.b32.xlu1 %v2599_v3, %s2341_s25  ;;  %412 = vrot.lane.b32.xlu0 %v2589_v1, %s2341_s25 }
  0xbd   : > { %418 = vrot.lane.b32.xlu1 %v2596_v2, %s2341_s25  ;;  %416 = vrot.lane.b32.xlu0 %v2586_v0, %s2341_s25 }
  0xc1   : > { %439 = vrot.lane.b32.xlu1 %v2599_v3, %s2342_s9  ;;  %437 = vrot.lane.b32.xlu0 %v2589_v1, %s2342_s9 }
  0xc5   : > { %443 = vrot.lane.b32.xlu1 %v2596_v2, %s2342_s9  ;;  %441 = vrot.lane.b32.xlu0 %v2586_v0, %s2342_s9 }
  0xc9   : > { %464 = vrot.lane.b32.xlu1 %v2599_v3, %s2343_s13  ;;  %462 = vrot.lane.b32.xlu0 %v2589_v1, %s2343_s13 }
  0xcd   : > { %468 = vrot.lane.b32.xlu1 %v2596_v2, %s2343_s13  ;;  %466 = vrot.lane.b32.xlu0 %v2586_v0, %s2343_s13 }
  0xd1   : > { %489 = vrot.lane.b32.xlu1 %v2599_v3, %s2344_s28  ;;  %487 = vrot.lane.b32.xlu0 %v2589_v1, %s2344_s28 }
  0xd5   : > { %493 = vrot.lane.b32.xlu1 %v2596_v2, %s2344_s28  ;;  %491 = vrot.lane.b32.xlu0 %v2586_v0, %s2344_s28 }
  0xd9   : > { %514 = vrot.lane.b32.xlu1 %v2599_v3, %s2345_s30  ;;  %512 = vrot.lane.b32.xlu0 %v2589_v1, %s2345_s30 }
  0xdd   : > { %518 = vrot.lane.b32.xlu1 %v2596_v2, %s2345_s30  ;;  %516 = vrot.lane.b32.xlu0 %v2586_v0, %s2345_s30 }
  0xe1   : > { %539 = vrot.lane.b32.xlu1 %v2599_v3, %s2346_s14  ;;  %537 = vrot.lane.b32.xlu0 %v2589_v1, %s2346_s14 }
  0xe5   : > { %543 = vrot.lane.b32.xlu1 %v2596_v2, %s2346_s14  ;;  %541 = vrot.lane.b32.xlu0 %v2586_v0, %s2346_s14 }
  0xe9   : > { %564 = vrot.lane.b32.xlu1 %v2599_v3, %s2347_s20  ;;  %562 = vrot.lane.b32.xlu0 %v2589_v1, %s2347_s20 }
  0xed   : > { %568 = vrot.lane.b32.xlu1 %v2596_v2, %s2347_s20  ;;  %566 = vrot.lane.b32.xlu0 %v2586_v0, %s2347_s20 }
  0xf1   : > { %601 = vrot.lane.b32.xlu1 %v2599_v3, %s3583_s6  ;;  %599 = vrot.lane.b32.xlu0 %v2589_v1, %s3583_s6 }
  0xf5   : > { %605 = vrot.lane.b32.xlu1 %v2596_v2, %s3583_s6  ;;  %603 = vrot.lane.b32.xlu0 %v2586_v0, %s3583_s6  ;;  %s3585_s6 = smov 120  }
  0xf9   : > { %626 = vrot.lane.b32.xlu1 %v2599_v3, %s2349_s10  ;;  %624 = vrot.lane.b32.xlu0 %v2589_v1, %s2349_s10 }
  0xfb   : > { %v265_v6 = vpop.permute.xlu1 %264  ;;  %v261_v7 = vpop.permute.xlu0 %260 }
  0xfd   : > { %630 = vrot.lane.b32.xlu1 %v2596_v2, %s2349_s10  ;;  %628 = vrot.lane.b32.xlu0 %v2586_v0, %s2349_s10 }
  0xff   : > { %v267_v8 = vpop.permute.xlu1 %266  ;;  %v263_v9 = vpop.permute.xlu0 %262 }
 0x100   : > { %v273_v10 = vsel %vm270_vm0, %v261_v7, %v263_v9  ;;  %v274_v16 = vsel %vm270_vm0, %v267_v8, %v261_v7  ;;  %v272_v18 = vsel %vm270_vm0, %v263_v9, %v265_v6  ;;  %v271_v24 = vsel %vm270_vm0, %v265_v6, %v267_v8  ;;  %v326_v7 = vld [vmem:[#allocation9 + $0x48] sm:$0xff]  ;;  %v723_v9 = vld [vmem:[#allocation9 + $0x280] sm:$0xff] }
 0x101   : > { %651 = vrot.lane.b32.xlu1 %v2599_v3, %s3585_s6  ;;  %649 = vrot.lane.b32.xlu0 %v2589_v1, %s3585_s6  ;;  %v280_v21 = vmul.f32 %v276_v11, %v273_v10  ;;  %v2739_v28 = vmul.f32 %v699_v13, %v273_v10  ;;  %v2743_v31 = vmul.f32 %v702_v15, %v274_v16  ;;  %v351_v10 = vld [vmem:[#allocation9 + $0x68] sm:$0xff]  ;;  %v735_v11 = vld [vmem:[#allocation9 + $0x2a0] sm:$0xff] }
 0x102   : > { %v2745_v32 = vmul.f32 %v700_v17, %v272_v18  ;;  %v279_v39 = vmul.f32 %v275_v23, %v274_v16  ;;  %v282_v40 = vmul.f32 %v278_v25, %v271_v24  ;;  %v2755_v48 = vmul.f32 %v701_v30, %v271_v24  ;;  %v726_v17 = vld [vmem:[#allocation9 + $0x298] sm:$0xff]  ;;  %v724_v23 = vld [vmem:[#allocation9 + $0x288] sm:$0xff] }
 0x103   : > { %v290_v19 = vpop.permute.xlu1 %289  ;;  %v288_v20 = vpop.permute.xlu0 %287  ;;  %v281_v54 = vmul.f32 %v277_v42, %v272_v18  ;;  %v327_v18 = vld [vmem:[#allocation9 + $0x50] sm:$0xff] }
 0x104   : > { %v298_v22 = vsel %vm295_vm1, %v288_v20, %v290_v19 }
 0x105   : > { %655 = vrot.lane.b32.xlu1 %v2596_v2, %s3585_s6  ;;  %653 = vrot.lane.b32.xlu0 %v2586_v0, %s3585_s6  ;;  %v305_v27 = vmul.f32 %v301_v12, %v298_v22  ;;  %v2741_v29 = vmul.f32 %v711_v14, %v298_v22  ;;  %s2351_s6 = smov 119   ;;  %v325_v12 = vld [vmem:[#allocation9 + $0x40] sm:$0xff]  ;;  %v328_v22 = vld [vmem:[#allocation9 + $0x58] sm:$0xff] }
 0x107   : > { %v294_v36 = vpop.permute.xlu1 %293  ;;  %v292_v37 = vpop.permute.xlu0 %291  ;;  %v916_v38 = vpack.c.bf16 %v305_v27, %v280_v21  ;;  %v350_v27 = vld [vmem:[#allocation9 + $0x60] sm:$0xff] }
 0x108   : > { %v299_v45 = vsel %vm295_vm1, %v294_v36, %v288_v20  ;;  %v297_v46 = vsel %vm295_vm1, %v290_v19, %v292_v37  ;;  %v296_v47 = vsel %vm295_vm1, %v292_v37, %v294_v36  ;;  %v725_v37 = vld [vmem:[#allocation9 + $0x290] sm:$0xff] }
 0x109   : > { %v2757_v49 = vmul.f32 %v714_v26, %v299_v45  ;;  %v2759_v50 = vmul.f32 %v712_v33, %v297_v46  ;;  %676 = vrot.lane.b32.xlu1 %v2599_v3, %s2351_s6  ;;  %674 = vrot.lane.b32.xlu0 %v2589_v1, %s2351_s6  ;;  %v304_v51 = vmul.f32 %v300_v34, %v299_v45  ;;  %v738_v33 = vld [vmem:[#allocation9 + $0x2b8] sm:$0xff]  ;;  %v352_v34 = vld [vmem:[#allocation9 + $0x70] sm:$0xff] }
 0x10a   : > { %994 = vmatprep.subr.bf16.mxu0 %v916_v38  ;;  %v307_v52 = vmul.f32 %v303_v35, %v296_v47  ;;  %v2765_v53 = vmul.f32 %v713_v41, %v296_v47  ;;  %v306_v55 = vmul.f32 %v302_v43, %v297_v46  ;;  %v353_v35 = vld [vmem:[#allocation9 + $0x78] sm:$0xff]  ;;  %v737_v41 = vld [vmem:[#allocation9 + $0x2b0] sm:$0xff] }
 0x10b   : > { %v315_v56 = vpop.permute.xlu1 %314  ;;  %v313_v57 = vpop.permute.xlu0 %312  ;;  %v915_v58 = vpack.c.bf16 %v304_v51, %v279_v39 }
 0x10c   : > { %v918_v61 = vpack.c.bf16 %v307_v52, %v282_v40  ;;  %v917_v62 = vpack.c.bf16 %v306_v55, %v281_v54  ;;  %v323_v8 = vsel %vm320_vm2, %v313_v57, %v315_v56  ;;  %v736_v40 = vld [vmem:[#allocation9 + $0x2a8] sm:$0xff] }
 0x10d   : > { %680 = vrot.lane.b32.xlu1 %v2596_v2, %s2351_s6  ;;  %678 = vrot.lane.b32.xlu0 %v2586_v0, %s2351_s6  ;;  %v330_v16 = vmul.f32 %v326_v7, %v323_v8  ;;  %v2787_v21 = vmul.f32 %v723_v9, %v323_v8 }
 0x10e   : > { %995 = vmatpush1.bf16.msra.mxu0 %v915_v58  ;;  %1035 = vmatprep.subr.bf16.mxu1 %v918_v61 }
 0x10f   : > { %1036 = vmatpush1.bf16.msra.mxu1 %v917_v62  ;;  %v319_v4 = vpop.permute.xlu1 %318  ;;  %v317_v6 = vpop.permute.xlu0 %316 }
 0x110   : > { %v324_v13 = vsel %vm320_vm2, %v319_v4, %v313_v57  ;;  %v322_v19 = vsel %vm320_vm2, %v315_v56, %v317_v6  ;;  %v321_v24 = vsel %vm320_vm2, %v317_v6, %v319_v4  ;;  %v2813_v6 = vld [vmem:[#allocation6] sm:$0xff] }
 0x111   : > { %v329_v30 = vmul.f32 %v325_v12, %v324_v13  ;;  %v2793_v36 = vmul.f32 %v726_v17, %v324_v13  ;;  %v331_v38 = vmul.f32 %v327_v18, %v322_v19  ;;  %v332_v46 = vmul.f32 %v328_v22, %v321_v24  ;;  %3618 = vst [vmem:[#allocation16_spill] sm:$0xff] %v2813_v6  ;;  %v376_v18 = vld [vmem:[#allocation9 + $0x88] sm:$0xff] }
 0x112   : > { %v2805_v58 = vmul.f32 %v724_v23, %v322_v19  ;;  %v2807_v61 = vmul.f32 %v725_v37, %v321_v24  ;;  %v401_v22 = vld [vmem:[#allocation9 + $0xa8] sm:$0xff]  ;;  %v759_v23 = vld [vmem:[#allocation9 + $0x2e0] sm:$0xff] }
 0x113   : > { %v340_v14 = vpop.permute.xlu1 %339  ;;  %v338_v15 = vpop.permute.xlu0 %337  ;;  %v375_v24 = vld [vmem:[#allocation9 + $0x80] sm:$0xff] }
 0x114   : > { %v348_v20 = vsel %vm345_vm3, %v338_v15, %v340_v14 }
 0x115   : > { %v355_v25 = vmul.f32 %v351_v10, %v348_v20  ;;  %v2791_v26 = vmul.f32 %v735_v11, %v348_v20  ;;  %v747_v20 = vld [vmem:[#allocation9 + $0x2c0] sm:$0xff] }
 0x117   : > { %v344_v39 = vpop.permute.xlu1 %343  ;;  %v342_v42 = vpop.permute.xlu0 %341  ;;  %v920_v43 = vpack.c.bf16 %v355_v25, %v330_v16 }
 0x118   : > { %v349_v47 = vsel %vm345_vm3, %v344_v39, %v338_v15  ;;  %v346_v51 = vsel %vm345_vm3, %v342_v42, %v344_v39  ;;  %v347_v52 = vsel %vm345_vm3, %v340_v14, %v342_v42  ;;  %v2018_v15 = vcombine.high %v2813_v6, %v2813_v6 }
 0x119   : > { %v354_v54 = vmul.f32 %v350_v27, %v349_v47  ;;  %v2803_v55 = vmul.f32 %v738_v33, %v349_v47  ;;  %v356_v56 = vmul.f32 %v352_v34, %v347_v52  ;;  %v357_v57 = vmul.f32 %v353_v35, %v346_v51  ;;  %996 = vmatprep.subr.bf16.mxu0 %v920_v43  ;;  %v750_v34 = vld [vmem:[#allocation9 + $0x2d8] sm:$0xff]  ;;  %v377_v35 = vld [vmem:[#allocation9 + $0x90] sm:$0xff]  ;;  %v400_v47 = vld [vmem:[#allocation9 + $0xa0] sm:$0xff] }
 0x11a   : > { %v2809_v62 = vmul.f32 %v736_v40, %v347_v52  ;;  %v2811_v4 = vmul.f32 %v737_v41, %v346_v51  ;;  %2020 = vmatprep.mubr.msk.bf16.mxu0 %vm977_vm4, %v2018_v15  ;;  %2022 = vmatprep.mubr.msk.bf16.mxu1 %vm977_vm4, %v2018_v15  ;;  %v378_v40 = vld [vmem:[#allocation9 + $0x98] sm:$0xff]  ;;  %v748_v41 = vld [vmem:[#allocation9 + $0x2c8] sm:$0xff] }
 0x11b   : > { %v365_v7 = vpop.permute.xlu1 %364  ;;  %v363_v8 = vpop.permute.xlu0 %362  ;;  %v919_v9 = vpack.c.bf16 %v354_v54, %v329_v30  ;;  %v922_v10 = vpack.c.bf16 %v357_v57, %v332_v46  ;;  %v921_v11 = vpack.c.bf16 %v356_v56, %v331_v38  ;;  %v762_v52 = vld [vmem:[#allocation9 + $0x2f8] sm:$0xff]  ;;  %v402_v54 = vld [vmem:[#allocation9 + $0xb0] sm:$0xff] }
 0x11c   : > { %v373_v19 = vsel %vm370_vm5, %v363_v8, %v365_v7  ;;  %v403_v56 = vld [vmem:[#allocation9 + $0xb8] sm:$0xff] }
 0x11d   : > { %997 = vmatpush1.bf16.msra.mxu0 %v919_v9  ;;  %1037 = vmatprep.subr.bf16.mxu1 %v922_v10  ;;  %v380_v33 = vmul.f32 %v376_v18, %v373_v19  ;;  %v2835_v39 = vmul.f32 %v747_v20, %v373_v19  ;;  %v760_v10 = vld [vmem:[#allocation9 + $0x2e8] sm:$0xff] }
 0x11e   : > { %1038 = vmatpush1.bf16.msra.mxu1 %v921_v11  ;;  %v761_v11 = vld [vmem:[#allocation9 + $0x2f0] sm:$0xff] }
 0x11f   : > { %v369_v16 = vpop.permute.xlu1 %368  ;;  %v367_v17 = vpop.permute.xlu0 %366 }
 0x120   : > { %v374_v25 = vsel %vm370_vm5, %v369_v16, %v363_v8  ;;  %v372_v37 = vsel %vm370_vm5, %v365_v7, %v367_v17  ;;  %v371_v42 = vsel %vm370_vm5, %v367_v17, %v369_v16  ;;  %v749_v7 = vld [vmem:[#allocation9 + $0x2d0] sm:$0xff] }
 0x121   : > { %v379_v51 = vmul.f32 %v375_v24, %v374_v25  ;;  %v2841_v57 = vmul.f32 %v750_v34, %v374_v25  ;;  %v381_v8 = vmul.f32 %v377_v35, %v372_v37  ;;  %v382_v17 = vmul.f32 %v378_v40, %v371_v42 }
 0x122   : > { %v2855_v35 = vmul.f32 %v749_v7, %v371_v42  ;;  %v783_v7 = vld [vmem:[#allocation9 + $0x320] sm:$0xff] }
 0x123   : > { %v390_v27 = vpop.permute.xlu1 %389  ;;  %v388_v30 = vpop.permute.xlu0 %387 }
 0x124   : > { %v398_v38 = vsel %vm395_vm6, %v388_v30, %v390_v27 }
 0x125   : > { %v405_v43 = vmul.f32 %v401_v22, %v398_v38  ;;  %v2839_v46 = vmul.f32 %v759_v23, %v398_v38 }
 0x127   : > { %v394_v9 = vpop.permute.xlu1 %393  ;;  %v392_v15 = vpop.permute.xlu0 %391  ;;  %v924_v18 = vpack.c.bf16 %v405_v43, %v380_v33  ;;  %v2853_v33 = vmul.f32 %v748_v41, %v372_v37  ;;  %v786_v37 = vld [vmem:[#allocation9 + $0x338] sm:$0xff] }
 0x128   : > { %v399_v19 = vsel %vm395_vm6, %v394_v9, %v388_v30  ;;  %v396_v20 = vsel %vm395_vm6, %v392_v15, %v394_v9  ;;  %v397_v22 = vsel %vm395_vm6, %v390_v27, %v392_v15  ;;  %v452_v27 = vld [vmem:[#allocation9 + $0xf0] sm:$0xff] }
 0x129   : > { %v404_v23 = vmul.f32 %v400_v47, %v399_v19  ;;  %v2851_v24 = vmul.f32 %v762_v52, %v399_v19  ;;  %v406_v25 = vmul.f32 %v402_v54, %v397_v22  ;;  %v407_v34 = vmul.f32 %v403_v56, %v396_v20  ;;  %998 = vmatprep.subr.bf16.mxu0 %v924_v18  ;;  %v426_v52 = vld [vmem:[#allocation9 + $0xc8] sm:$0xff]  ;;  %v771_v54 = vld [vmem:[#allocation9 + $0x300] sm:$0xff]  ;;  %v453_v47 = vld [vmem:[#allocation9 + $0xf8] sm:$0xff] }
 0x12a   : > { %v2857_v38 = vmul.f32 %v760_v10, %v397_v22  ;;  %v2859_v40 = vmul.f32 %v761_v11, %v396_v20  ;;  %v451_v56 = vld [vmem:[#allocation9 + $0xe8] sm:$0xff]  ;;  %v428_v22 = vld [vmem:[#allocation9 + $0xd8] sm:$0xff] }
 0x12b   : > { %v415_v30 = vpop.permute.xlu1 %414  ;;  %v413_v43 = vpop.permute.xlu0 %412  ;;  %v923_v9 = vpack.c.bf16 %v404_v23, %v379_v51  ;;  %v926_v16 = vpack.c.bf16 %v407_v34, %v382_v17  ;;  %v925_v14 = vpack.c.bf16 %v406_v25, %v381_v8  ;;  %v425_v8 = vld [vmem:[#allocation9 + $0xc0] sm:$0xff]  ;;  %v772_v23 = vld [vmem:[#allocation9 + $0x308] sm:$0xff] }
 0x12c   : > { %v423_v51 = vsel %vm420_vm7, %v413_v43, %v415_v30 }
 0x12d   : > { %999 = vmatpush1.bf16.msra.mxu0 %v923_v9  ;;  %1039 = vmatprep.subr.bf16.mxu1 %v926_v16  ;;  %v430_v18 = vmul.f32 %v426_v52, %v423_v51  ;;  %v774_v16 = vld [vmem:[#allocation9 + $0x318] sm:$0xff]  ;;  %v2877_v20 = vmul.f32 %v771_v54, %v423_v51  ;;  %v450_v9 = vld [vmem:[#allocation9 + $0xe0] sm:$0xff]  ;;  %v784_v51 = vld [vmem:[#allocation9 + $0x328] sm:$0xff] }
 0x12e   : > { %1040 = vmatpush1.bf16.msra.mxu1 %v925_v14  ;;  %v427_v14 = vld [vmem:[#allocation9 + $0xd0] sm:$0xff] }
 0x12f   : > { %v419_v41 = vpop.permute.xlu1 %418  ;;  %v417_v42 = vpop.permute.xlu0 %416  ;;  %3619 = vst [vmem:[#allocation17_spill] sm:$0xff] %v2877_v20  ;;  %v785_v54 = vld [vmem:[#allocation9 + $0x330] sm:$0xff] }
 0x130   : > { %v424_v10 = vsel %vm420_vm7, %v419_v41, %v413_v43  ;;  %v422_v17 = vsel %vm420_vm7, %v415_v30, %v417_v42  ;;  %v421_v25 = vsel %vm420_vm7, %v417_v42, %v419_v41  ;;  %v773_v30 = vld [vmem:[#allocation9 + $0x310] sm:$0xff] }
 0x131   : > { %v429_v52 = vmul.f32 %v425_v8, %v424_v10  ;;  %v2883_v45 = vmul.f32 %v774_v16, %v424_v10  ;;  %v431_v12 = vmul.f32 %v427_v14, %v422_v17  ;;  %v432_v42 = vmul.f32 %v428_v22, %v421_v25 }
 0x133   : > { %v440_v11 = vpop.permute.xlu1 %439  ;;  %v438_v15 = vpop.permute.xlu0 %437  ;;  %3621 = vst [vmem:[#allocation19_spill] sm:$0xff] %v2883_v45  ;;  %v590_v45 = vld [vmem:[#allocation9 + $0x1b8] sm:$0xff] }
 0x134   : > { %v448_v19 = vsel %vm445_vm8, %v438_v15, %v440_v11 }
 0x135   : > { %v455_v34 = vmul.f32 %v451_v56, %v448_v19  ;;  %v2881_v43 = vmul.f32 %v783_v7, %v448_v19 }
 0x137   : > { %3620 = vst [vmem:[#allocation18_spill] sm:$0xff] %v2881_v43  ;;  %v444_v13 = vpop.permute.xlu1 %443  ;;  %v442_v63 = vpop.permute.xlu0 %441  ;;  %v928_v44 = vpack.c.bf16 %v455_v34, %v430_v18  ;;  %v2895_v18 = vmul.f32 %v772_v23, %v422_v17  ;;  %v2897_v34 = vmul.f32 %v773_v30, %v421_v25  ;;  %v501_v17 = vld [vmem:[#allocation9 + $0x128] sm:$0xff]  ;;  %v477_v30 = vld [vmem:[#allocation9 + $0x110] sm:$0xff]  ;;  %v587_v43 = vld [vmem:[#allocation9 + $0x1a0] sm:$0xff] }
 0x138   : > { %v449_v56 = vsel %vm445_vm8, %v444_v13, %v438_v15  ;;  %v446_v7 = vsel %vm445_vm8, %v442_v63, %v444_v13  ;;  %v447_v8 = vsel %vm445_vm8, %v440_v11, %v442_v63  ;;  %v476_v11 = vld [vmem:[#allocation9 + $0x108] sm:$0xff] }
 0x139   : > { %v454_v10 = vmul.f32 %v450_v9, %v449_v56  ;;  %v2893_v16 = vmul.f32 %v786_v37, %v449_v56  ;;  %v456_v14 = vmul.f32 %v452_v27, %v447_v8  ;;  %v457_v19 = vmul.f32 %v453_v47, %v446_v7  ;;  %1000 = vmatprep.subr.bf16.mxu0 %v928_v44  ;;  %v475_v9 = vld [vmem:[#allocation9 + $0x100] sm:$0xff] }
 0x13a   : > { %3622 = vst [vmem:[#allocation20_spill] sm:$0xff] %v2897_v34  ;;  %v2899_v22 = vmul.f32 %v784_v51, %v447_v8  ;;  %v2901_v41 = vmul.f32 %v785_v54, %v446_v7  ;;  %v478_v51 = vld [vmem:[#allocation9 + $0x118] sm:$0xff]  ;;  %v500_v7 = vld [vmem:[#allocation9 + $0x120] sm:$0xff]  ;;  %v502_v8 = vld [vmem:[#allocation9 + $0x130] sm:$0xff] }
 0x13b   : > { %v465_v15 = vpop.permute.xlu1 %464  ;;  %v463_v60 = vpop.permute.xlu0 %462  ;;  %v927_v13 = vpack.c.bf16 %v454_v10, %v429_v52  ;;  %v930_v59 = vpack.c.bf16 %v457_v19, %v432_v42  ;;  %v929_v6 = vpack.c.bf16 %v456_v14, %v431_v12 }
 0x13c   : > { %3623 = vst [vmem:[#allocation21_spill] sm:$0xff] %v2901_v41  ;;  %v2913_v12 = vsel %vm470_vm9, %v463_v60, %v465_v15 }
 0x13d   : > { %1001 = vmatpush1.bf16.msra.mxu0 %v927_v13  ;;  %1041 = vmatprep.subr.bf16.mxu1 %v930_v59 }
 0x13e   : > { %1042 = vmatpush1.bf16.msra.mxu1 %v929_v6  ;;  %v480_v6 = vmul.f32 %v476_v11, %v2913_v12 }
 0x13f   : > { %v469_v47 = vpop.permute.xlu1 %468  ;;  %v467_v37 = vpop.permute.xlu0 %466 }
 0x140   : > { %v2917_v52 = vsel %vm470_vm9, %v469_v47, %v463_v60  ;;  %v2924_v54 = vsel %vm470_vm9, %v465_v15, %v467_v37  ;;  %v2928_v56 = vsel %vm470_vm9, %v467_v37, %v469_v47  ;;  %v503_v60 = vld [vmem:[#allocation9 + $0x138] sm:$0xff] }
 0x141   : > { %v479_v10 = vmul.f32 %v475_v9, %v2917_v52  ;;  %v481_v11 = vmul.f32 %v477_v30, %v2924_v54  ;;  %v482_v37 = vmul.f32 %v478_v51, %v2928_v56  ;;  %v551_v51 = vld [vmem:[#allocation9 + $0x168] sm:$0xff] }
 0x143   : > { %v490_v23 = vpop.permute.xlu1 %489  ;;  %v488_v25 = vpop.permute.xlu0 %487 }
 0x144   : > { %v498_v59 = vsel %vm495_vm10, %v488_v25, %v490_v23 }
 0x145   : > { %v505_v42 = vmul.f32 %v501_v17, %v498_v59 }
 0x147   : > { %v494_v14 = vpop.permute.xlu1 %493  ;;  %v492_v19 = vpop.permute.xlu0 %491  ;;  %v932_v13 = vpack.c.bf16 %v505_v42, %v480_v6 }
 0x148   : > { %v499_v44 = vsel %vm495_vm10, %v494_v14, %v488_v25  ;;  %v496_v15 = vsel %vm495_vm10, %v492_v19, %v494_v14  ;;  %v497_v47 = vsel %vm495_vm10, %v490_v23, %v492_v19  ;;  %v526_v23 = vld [vmem:[#allocation9 + $0x148] sm:$0xff] }
 0x149   : > { %v504_v17 = vmul.f32 %v500_v7, %v499_v44  ;;  %v506_v59 = vmul.f32 %v502_v8, %v497_v47  ;;  %v507_v63 = vmul.f32 %v503_v60, %v496_v15  ;;  %1002 = vmatprep.subr.bf16.mxu0 %v932_v13  ;;  %v525_v60 = vld [vmem:[#allocation9 + $0x140] sm:$0xff]  ;;  %v527_v13 = vld [vmem:[#allocation9 + $0x150] sm:$0xff] }
 0x14b   : > { %v515_v9 = vpop.permute.xlu1 %514  ;;  %v513_v27 = vpop.permute.xlu0 %512  ;;  %v931_v6 = vpack.c.bf16 %v504_v17, %v479_v10  ;;  %v934_v42 = vpack.c.bf16 %v507_v63, %v482_v37  ;;  %v933_v30 = vpack.c.bf16 %v506_v59, %v481_v11  ;;  %v528_v11 = vld [vmem:[#allocation9 + $0x158] sm:$0xff]  ;;  %v550_v17 = vld [vmem:[#allocation9 + $0x160] sm:$0xff]  ;;  %v552_v59 = vld [vmem:[#allocation9 + $0x170] sm:$0xff] }
 0x14c   : > { %v523_v44 = vsel %vm520_vm11, %v513_v27, %v515_v9 }
 0x14d   : > { %1003 = vmatpush1.bf16.msra.mxu0 %v931_v6  ;;  %1043 = vmatprep.subr.bf16.mxu1 %v934_v42  ;;  %v530_v19 = vmul.f32 %v526_v23, %v523_v44  ;;  %v553_v6 = vld [vmem:[#allocation9 + $0x178] sm:$0xff] }
 0x14e   : > { %1044 = vmatpush1.bf16.msra.mxu1 %v933_v30 }
 0x14f   : > { %v519_v25 = vpop.permute.xlu1 %518  ;;  %v517_v14 = vpop.permute.xlu0 %516 }
 0x150   : > { %v524_v63 = vsel %vm520_vm11, %v519_v25, %v513_v27  ;;  %v522_v15 = vsel %vm520_vm11, %v515_v9, %v517_v14  ;;  %v521_v37 = vsel %vm520_vm11, %v517_v14, %v519_v25  ;;  %v588_v25 = vld [vmem:[#allocation9 + $0x1a8] sm:$0xff] }
 0x151   : > { %v529_v42 = vmul.f32 %v525_v60, %v524_v63  ;;  %v531_v41 = vmul.f32 %v527_v13, %v522_v15  ;;  %v532_v14 = vmul.f32 %v528_v11, %v521_v37  ;;  %v576_v63 = vld [vmem:[#allocation9 + $0x188] sm:$0xff]  ;;  %v575_v11 = vld [vmem:[#allocation9 + $0x180] sm:$0xff]  ;;  %v577_v37 = vld [vmem:[#allocation9 + $0x190] sm:$0xff] }
 0x153   : > { %v540_v7 = vpop.permute.xlu1 %539  ;;  %v538_v8 = vpop.permute.xlu0 %537 }
 0x154   : > { %v548_v10 = vsel %vm545_vm12, %v538_v8, %v540_v7 }
 0x155   : > { %v555_v47 = vmul.f32 %v551_v51, %v548_v10 }
 0x157   : > { %v544_v30 = vpop.permute.xlu1 %543  ;;  %v542_v34 = vpop.permute.xlu0 %541  ;;  %v936_v27 = vpack.c.bf16 %v555_v47, %v530_v19 }
 0x158   : > { %v549_v23 = vsel %vm545_vm12, %v544_v30, %v538_v8  ;;  %v546_v9 = vsel %vm545_vm12, %v542_v34, %v544_v30  ;;  %v547_v44 = vsel %vm545_vm12, %v540_v7, %v542_v34  ;;  %v592_v8 = vmul.f32 %v588_v25, %v2599_v3  ;;  %v589_v34 = vld [vmem:[#allocation9 + $0x1b0] sm:$0xff] }
 0x159   : > { %v554_v51 = vmul.f32 %v550_v17, %v549_v23  ;;  %v556_v10 = vmul.f32 %v552_v59, %v547_v44  ;;  %v557_v60 = vmul.f32 %v553_v6, %v546_v9  ;;  %1004 = vmatprep.subr.bf16.mxu0 %v936_v27  ;;  %v578_v17 = vld [vmem:[#allocation9 + $0x198] sm:$0xff]  ;;  %v594_v3 = vmul.f32 %v590_v45, %v2596_v2 }
 0x15a   : > { %v593_v27 = vmul.f32 %v589_v34, %v2586_v0 }
 0x15b   : > { %v565_v19 = vpop.permute.xlu1 %564  ;;  %v563_v47 = vpop.permute.xlu0 %562  ;;  %v935_v20 = vpack.c.bf16 %v554_v51, %v529_v42  ;;  %v938_v13 = vpack.c.bf16 %v557_v60, %v532_v14  ;;  %v937_v15 = vpack.c.bf16 %v556_v10, %v531_v41  ;;  %v591_v41 = vmul.f32 %v587_v43, %v2589_v1 }
 0x15c   : > { %v573_v30 = vsel %vm570_vm13, %v563_v47, %v565_v19 }
 0x15d   : > { %v580_v7 = vmul.f32 %v576_v63, %v573_v30  ;;  %1005 = vmatpush1.bf16.msra.mxu0 %v935_v20  ;;  %1045 = vmatprep.subr.bf16.mxu1 %v938_v13  ;;  %v613_v13 = vld [vmem:[#allocation9 + $0x1c8] sm:$0xff]  ;;  %v637_v30 = vld [vmem:[#allocation9 + $0x1e0] sm:$0xff] }
 0x15e   : > { %1046 = vmatpush1.bf16.msra.mxu1 %v937_v15 }
 0x15f   : > { %v569_v59 = vpop.permute.xlu1 %568  ;;  %v567_v6 = vpop.permute.xlu0 %566  ;;  %v940_v42 = vpack.c.bf16 %v592_v8, %v580_v7  ;;  %v614_v8 = vld [vmem:[#allocation9 + $0x1d0] sm:$0xff] }
 0x160   : > { %v574_v23 = vsel %vm570_vm13, %v569_v59, %v563_v47  ;;  %v571_v20 = vsel %vm570_vm13, %v567_v6, %v569_v59  ;;  %v572_v9 = vsel %vm570_vm13, %v565_v19, %v567_v6  ;;  %v615_v19 = vld [vmem:[#allocation9 + $0x1d8] sm:$0xff]  ;;  %v612_v59 = vld [vmem:[#allocation9 + $0x1c0] sm:$0xff] }
 0x161   : > { %v579_v44 = vmul.f32 %v575_v11, %v574_v23  ;;  %v581_v25 = vmul.f32 %v577_v37, %v572_v9  ;;  %v582_v14 = vmul.f32 %v578_v17, %v571_v20  ;;  %1006 = vmatprep.subr.bf16.mxu0 %v940_v42  ;;  %v640_v11 = vld [vmem:[#allocation9 + $0x1f8] sm:$0xff]  ;;  %v638_v37 = vld [vmem:[#allocation9 + $0x1e8] sm:$0xff]  ;;  %v639_v17 = vld [vmem:[#allocation9 + $0x1f0] sm:$0xff] }
 0x163   : > { %v602_v51 = vpop.permute.xlu1 %601  ;;  %v600_v10 = vpop.permute.xlu0 %599  ;;  %v939_v1 = vpack.c.bf16 %v591_v41, %v579_v44  ;;  %v942_v43 = vpack.c.bf16 %v594_v3, %v582_v14  ;;  %v941_v2 = vpack.c.bf16 %v593_v27, %v581_v25 }
 0x164   : > { %v610_v6 = vsel %vm3593_vm15, %v600_v10, %v602_v51 }
 0x165   : > { %1007 = vmatpush1.bf16.msra.mxu0 %v939_v1  ;;  %1047 = vmatprep.subr.bf16.mxu1 %v942_v43 }
 0x166   : > { %1048 = vmatpush1.bf16.msra.mxu1 %v941_v2  ;;  %v616_v2 = vmul.f32 %v612_v59, %v610_v6  ;;  %v690_v6 = vld [vmem:[#allocation9 + $0x238] sm:$0xff] }
 0x167   : > { %v606_v0 = vpop.permute.xlu1 %605  ;;  %v604_v45 = vpop.permute.xlu0 %603 }
 0x168   : > { %v611_v47 = vsel %vm3593_vm15, %v606_v0, %v600_v10  ;;  %v609_v15 = vsel %vm3593_vm15, %v602_v51, %v604_v45  ;;  %v608_v7 = vsel %vm3593_vm15, %v604_v45, %v606_v0  ;;  %vm3595_vm15 = vcmp.lt.s32.totalorder %v2713_v5, 119 }
 0x169   : > { %v619_v42 = vmul.f32 %v615_v19, %v611_v47  ;;  %v617_v41 = vmul.f32 %v613_v13, %v609_v15  ;;  %v618_v25 = vmul.f32 %v614_v8, %v608_v7  ;;  %v665_v8 = vld [vmem:[#allocation9 + $0x218] sm:$0xff] }
 0x16b   : > { %v627_v60 = vpop.permute.xlu1 %626  ;;  %v625_v63 = vpop.permute.xlu0 %624 }
 0x16c   : > { %v635_v34 = vsel %vm3594_vm14, %v625_v63, %v627_v60 }
 0x16d   : > { %v641_v23 = vmul.f32 %v637_v30, %v635_v34  ;;  %v663_v34 = vld [vmem:[#allocation9 + $0x208] sm:$0xff] }
 0x16f   : > { %v631_v3 = vpop.permute.xlu1 %630  ;;  %v629_v27 = vpop.permute.xlu0 %628  ;;  %v943_v47 = vpack.c.bf16 %v641_v23, %v616_v2 }
 0x170   : > { %v636_v20 = vsel %vm3594_vm14, %v631_v3, %v625_v63  ;;  %v633_v9 = vsel %vm3594_vm14, %v629_v27, %v631_v3  ;;  %v634_v44 = vsel %vm3594_vm14, %v627_v60, %v629_v27  ;;  %vm657_vm14 = vcmp.lt.s32.totalorder %v2713_v5, 120  ;;  %v662_v3 = vld [vmem:[#allocation9 + $0x200] sm:$0xff] }
 0x171   : > { %v644_v14 = vmul.f32 %v640_v11, %v636_v20  ;;  %v642_v1 = vmul.f32 %v638_v37, %v634_v44  ;;  %v643_v43 = vmul.f32 %v639_v17, %v633_v9  ;;  %v664_v11 = vld [vmem:[#allocation9 + $0x210] sm:$0xff]  ;;  %v687_v37 = vld [vmem:[#allocation9 + $0x220] sm:$0xff] }
 0x173   : > { %v652_v51 = vpop.permute.xlu1 %651  ;;  %v650_v10 = vpop.permute.xlu0 %649  ;;  %v944_v0 = vpack.c.bf16 %v642_v1, %v617_v41  ;;  %v946_v45 = vpack.c.bf16 %v644_v14, %v619_v42  ;;  %v945_v19 = vpack.c.bf16 %v643_v43, %v618_v25  ;;  %v688_v42 = vld [vmem:[#allocation9 + $0x228] sm:$0xff]  ;;  %v689_v41 = vld [vmem:[#allocation9 + $0x230] sm:$0xff] }
 0x174   : > { %v660_v27 = vsel %vm657_vm14, %v650_v10, %v652_v51 }
 0x175   : > { %1008 = vmatprep.subr.bf16.mxu0 %v944_v0  ;;  %1049 = vmatprep.subr.bf16.mxu1 %v946_v45 }
 0x176   : > { %1009 = vmatpush1.bf16.msra.mxu0 %v943_v47  ;;  %1050 = vmatpush1.bf16.msra.mxu1 %v945_v19  ;;  %v666_v47 = vmul.f32 %v662_v3, %v660_v27 }
 0x177   : > { %v656_v63 = vpop.permute.xlu1 %655  ;;  %v654_v13 = vpop.permute.xlu0 %653 }
 0x178   : > { %v661_v30 = vsel %vm657_vm14, %v656_v63, %v650_v10  ;;  %v659_v7 = vsel %vm657_vm14, %v652_v51, %v654_v13  ;;  %v658_v59 = vsel %vm657_vm14, %v654_v13, %v656_v63 }
 0x179   : > { %v669_v23 = vmul.f32 %v665_v8, %v661_v30  ;;  %v667_v20 = vmul.f32 %v663_v34, %v659_v7  ;;  %v668_v2 = vmul.f32 %v664_v11, %v658_v59  ;;  %v3626_v8 = vpack.c.bf16 %v2741_v29, %v2739_v28  ;;  %v796_v7 = vld [vmem:[#allocation9 + $0x348] sm:$0xff]  ;;  %v795_v29 = vld [vmem:[#allocation9 + $0x340] sm:$0xff] }
 0x17a   : > { %v3627_v30 = vpack.c.bf16 %v2765_v53, %v2755_v48  ;;  %v3628_v34 = vpack.c.bf16 %v2809_v62, %v2805_v58  ;;  %v3631_v28 = vpack.c.bf16 %v2811_v4, %v2807_v61  ;;  %v797_v48 = vld [vmem:[#allocation9 + $0x350] sm:$0xff]  ;;  %v3633_v53 = vpack.c.bf16 %v2851_v24, %v2841_v57  ;;  %v3637_v4 = vld [vmem:[#allocation19_spill] sm:$0xff] }
 0x17b   : > { %v677_v60 = vpop.permute.xlu1 %676  ;;  %v675_v15 = vpop.permute.xlu0 %674  ;;  %v3634_v58 = vpack.c.bf16 %v2839_v46, %v2835_v39  ;;  %v3635_v61 = vpack.c.bf16 %v2859_v40, %v2855_v35  ;;  %v3636_v62 = vpack.c.bf16 %v2899_v22, %v2895_v18  ;;  %v3638_v57 = vpack.c.bf16 %v2893_v16, %v3637_v4  ;;  %v3642_v46 = vld [vmem:[#allocation21_spill] sm:$0xff]  ;;  %v3645_v18 = vld [vmem:[#allocation16_spill] sm:$0xff] }
 0x17c   : > { %v685_v17 = vsel %vm3595_vm15, %v675_v15, %v677_v60  ;;  %v2017_v22 = vcombine.low %v3645_v18, %v3645_v18 }
 0x17d   : > { %v691_v25 = vmul.f32 %v687_v37, %v685_v17 }
 0x17f   : > { %v681_v9 = vpop.permute.xlu1 %680  ;;  %v679_v44 = vpop.permute.xlu0 %678  ;;  %v947_v13 = vpack.c.bf16 %v691_v25, %v666_v47  ;;  %v1118_v47 = vld [vmem:[#allocation9 + $0x28] sm:$0xff] }
 0x180   : > { %v686_v14 = vsel %vm3595_vm15, %v681_v9, %v675_v15  ;;  %v683_v1 = vsel %vm3595_vm15, %v679_v44, %v681_v9  ;;  %v684_v43 = vsel %vm3595_vm15, %v677_v60, %v679_v44  ;;  %v3624_v15 = vpack.c.bf16 %v2759_v50, %v2745_v32  ;;  %v798_v50 = vld [vmem:[#allocation9 + $0x358] sm:$0xff] }
 0x181   : > { %v694_v0 = vmul.f32 %v690_v6, %v686_v14  ;;  %v692_v45 = vmul.f32 %v688_v42, %v684_v43  ;;  %v693_v19 = vmul.f32 %v689_v41, %v683_v1  ;;  %v3625_v60 = vpack.c.bf16 %v2757_v49, %v2743_v31  ;;  %v1094_v43 = vld [vmem:[#allocation9 + $0x8] sm:$0xff] }
 0x182   : > { %v3629_v32 = vpack.c.bf16 %v2803_v55, %v2793_v36  ;;  %v3630_v31 = vpack.c.bf16 %v2791_v26, %v2787_v21  ;;  %v3632_v49 = vpack.c.bf16 %v2857_v38, %v2853_v33  ;;  %v802_v36 = vmul.f32 %v798_v50, %v2917_v52  ;;  %v3639_v52 = vld [vmem:[#allocation18_spill] sm:$0xff] }
 0x183   : > { %v948_v51 = vpack.c.bf16 %v692_v45, %v667_v20  ;;  %v950_v10 = vpack.c.bf16 %v694_v0, %v669_v23  ;;  %v949_v63 = vpack.c.bf16 %v693_v19, %v668_v2  ;;  %v800_v55 = vmul.f32 %v796_v7, %v2924_v54  ;;  %v3640_v54 = vld [vmem:[#allocation17_spill] sm:$0xff]  ;;  %v1501_v2 = vld [vmem:[#allocation9 + $0x240] sm:$0xff] }
 0x184   : > { %v799_v21 = vmul.f32 %v795_v29, %v2913_v12  ;;  %v801_v26 = vmul.f32 %v797_v48, %v2928_v56  ;;  %v970_v24 = vpack.c.bf16 %v802_v36, %v802_v36  ;;  %v3641_v39 = vpack.c.bf16 %v3639_v52, %v3640_v54  ;;  %v3643_v56 = vld [vmem:[#allocation20_spill] sm:$0xff]  ;;  %v1502_v45 = vld [vmem:[#allocation9 + $0x248] sm:$0xff]  ;;  %v1119_v29 = vld [vmem:[#allocation9 + $0x30] sm:$0xff] }
 0x185   : > { %1010 = vmatprep.subr.bf16.mxu0 %v948_v51  ;;  %1051 = vmatprep.subr.bf16.mxu1 %v950_v10  ;;  %v968_v33 = vpack.c.bf16 %v800_v55, %v800_v55  ;;  %v3644_v35 = vpack.c.bf16 %v3642_v46, %v3643_v56  ;;  %vm981_vm15 = vcmask 1043456   ;;  %v1513_v51 = vld [vmem:[#allocation9 + $0x260] sm:$0xff]  ;;  %v1514_v48 = vld [vmem:[#allocation9 + $0x268] sm:$0xff] }
 0x186   : > { %1011 = vmatpush1.bf16.msra.mxu0 %v947_v13  ;;  %1052 = vmatpush1.bf16.msra.mxu1 %v949_v63  ;;  %v967_v38 = vpack.c.bf16 %v799_v21, %v799_v21  ;;  %v969_v12 = vpack.c.bf16 %v801_v26, %v801_v26  ;;  %v1093_v63 = vld [vmem:[#allocation9] sm:$0xff]  ;;  %v1096_v13 = vld [vmem:[#allocation9 + $0x18] sm:$0xff] }
 0x187   : > { %1012 = vmatprep.subr.bf16.mxu0 %v3624_v15  ;;  %1053 = vmatprep.subr.bf16.mxu1 %v3625_v60  ;;  %v1503_v15 = vld [vmem:[#allocation9 + $0x250] sm:$0xff] }
 0x188   : > { %v983_v40 = vsel %vm981_vm15, %v967_v38, 0  ;;  %v989_v16 = vsel %vm981_vm15, %v969_v12, 0 }
 0x18a   : > { %1013 = vmatpush1.bf16.msra.mxu0 %v3626_v8  ;;  %1054 = vmatpush1.bf16.msra.mxu1 %v3627_v30 }
 0x18b   : > { %1014 = vmatprep.subr.bf16.mxu0 %v3628_v34  ;;  %1055 = vmatprep.subr.bf16.mxu1 %v3629_v32  ;;  %v1504_v34 = vld [vmem:[#allocation9 + $0x258] sm:$0xff] }
 0x18e   : > { %1015 = vmatpush1.bf16.msra.mxu0 %v3630_v31  ;;  %1056 = vmatpush1.bf16.msra.mxu1 %v3631_v28 }
 0x18f   : > { %1016 = vmatprep.subr.bf16.mxu0 %v3632_v49  ;;  %1057 = vmatprep.subr.bf16.mxu1 %v3633_v53  ;;  %v1117_v49 = vld [vmem:[#allocation9 + $0x20] sm:$0xff] }
 0x192   : > { %1017 = vmatpush1.bf16.msra.mxu0 %v3634_v58  ;;  %1058 = vmatpush1.bf16.msra.mxu1 %v3635_v61  ;;  %v1120_v58 = vld [vmem:[#allocation9 + $0x38] sm:$0xff]  ;;  %v1515_v61 = vld [vmem:[#allocation9 + $0x270] sm:$0xff] }
 0x193   : > { %1018 = vmatprep.subr.bf16.mxu0 %v3636_v62  ;;  %1059 = vmatprep.subr.bf16.mxu1 %v3638_v57  ;;  %v1516_v62 = vld [vmem:[#allocation9 + $0x278] sm:$0xff]  ;;  %v1239_v57 = vld [vmem:[#allocation9 + $0xd0] sm:$0xff] }
 0x196   : > { %1019 = vmatpush1.bf16.msra.mxu0 %v3641_v39  ;;  %1060 = vmatpush1.bf16.msra.mxu1 %v3644_v35 }
 0x197   : > { %2019 = vmatprep.subr.msk.bf16.mxu0 %vm981_vm15, %v968_v33  ;;  %2021 = vmatprep.subr.msk.bf16.mxu1 %vm981_vm15, %v970_v24 }
 0x19a   : > { %1021 = vmatpush1.bf16.msra.mxu0 %v983_v40  ;;  %1062 = vmatpush1.bf16.msra.mxu1 %v989_v16  ;;  %v2136_v16 = vld [vmem:[#allocation9 + $0x10] sm:$0xff] }
 0x19d   : > { %1027 = vmatmul.mubr.bf16.vlgmr.msra.gmra.mrb[0].mxu0 %v2017_v22  ;;  %1068 = vmatmul.mubr.bf16.vlgmr.msra.gmra.mrb[0].mxu1 %v2017_v22 }
 0x270   : > { %v1028_v11 = vpop.f32.mrb[0].mxu0  ;;  %v1069_v37 = vpop.f32.mrb[0].mxu1 }
 0x271   : > { %v3064_v17 = vmax.f32 %v1028_v11, 0.0  ;;  %v1030_v59 = vpop.f32.mrb[1].mxu0  ;;  %v1071_v6 = vpop.f32.mrb[1].mxu1  ;;  %v3068_v27 = vmax.f32 %v1069_v37, 0.0 }
 0x272   : > { %v3066_v42 = vmax.f32 %v1030_v59, 0.0  ;;  %v1032_v41 = vpop.f32.mrb[2].mxu0  ;;  %v1073_v3 = vpop.f32.mrb[2].mxu1  ;;  %v3072_v9 = vmax.f32 %v1071_v6, 0.0  ;;  %v1587_v59 = vld [vmem:[#allocation9 + $0x330] sm:$0xff] }
 0x273   : > { %1081 = vrot.lane.b32.xlu0 %v3064_v17, %s2335_s21  ;;  %v1033_v23 = vpop.f32.mrb[3].mxu0  ;;  %v1074_v20 = vpop.f32.mrb[3].mxu1 }
 0x274   : > { %1083 = vrot.lane.b32.xlu1 %v3066_v42, %s2335_s21 }
 0x277   : > { %1085 = vrot.lane.b32.xlu0 %v3068_v27, %s2335_s21 }
 0x278   : > { %1087 = vrot.lane.b32.xlu1 %v3072_v9, %s2335_s21  ;;  %s3646_s21 = smov 127  }
 0x27b   : > { %1105 = vrot.lane.b32.xlu0 %v3064_v17, %s2336_s23 }
 0x27c   : > { %1107 = vrot.lane.b32.xlu1 %v3066_v42, %s2336_s23 }
 0x27f   : > { %1109 = vrot.lane.b32.xlu0 %v3068_v27, %s2336_s23 }
 0x280   : > { %1111 = vrot.lane.b32.xlu1 %v3072_v9, %s2336_s23  ;;  %s3647_s23 = smov 120  }
 0x283   : > { %1129 = vrot.lane.b32.xlu0 %v3064_v17, %s2337_s24 }
 0x284   : > { %1131 = vrot.lane.b32.xlu1 %v3066_v42, %s2337_s24 }
 0x287   : > { %1133 = vrot.lane.b32.xlu0 %v3068_v27, %s2337_s24 }
 0x288   : > { %1135 = vrot.lane.b32.xlu1 %v3072_v9, %s2337_s24  ;;  %s3692_s24 = sshll.u32 %s2565_s26, 5 }
 0x28b   : > { %1153 = vrot.lane.b32.xlu0 %v3064_v17, %s2338_s29 }
 0x28c   : > { %1155 = vrot.lane.b32.xlu1 %v3066_v42, %s2338_s29 }
 0x28f   : > { %1157 = vrot.lane.b32.xlu0 %v3068_v27, %s2338_s29 }
 0x290   : > { %1159 = vrot.lane.b32.xlu1 %v3072_v9, %s2338_s29  ;;  %s253_s29 = scalar_lea.vmem [#allocation11], %s3692_s24 }
 0x293   : > { %1177 = vrot.lane.b32.xlu0 %v3064_v17, %s2339_s27 }
 0x294   : > { %1179 = vrot.lane.b32.xlu1 %v3066_v42, %s2339_s27 }
 0x297   : > { %1181 = vrot.lane.b32.xlu0 %v3068_v27, %s2339_s27 }
 0x298   : > { %1183 = vrot.lane.b32.xlu1 %v3072_v9, %s2339_s27  ;;  %s1903_s27 = sshll.u32 %s253_s29, 4  ;;  %s3532_s27 = int_to_ptr.vmem [resolvable:$true] %s1903_s27 }
 0x29b   : > { %1201 = vrot.lane.b32.xlu0 %v3064_v17, %s2340_s5 }
 0x29c   : > { %1203 = vrot.lane.b32.xlu1 %v3066_v42, %s2340_s5 }
 0x29f   : > { %1205 = vrot.lane.b32.xlu0 %v3068_v27, %s2340_s5 }
 0x2a0   : > { %1207 = vrot.lane.b32.xlu1 %v3072_v9, %s2340_s5 }
 0x2a3   : > { %1225 = vrot.lane.b32.xlu0 %v3064_v17, %s2341_s25 }
 0x2a4   : > { %1227 = vrot.lane.b32.xlu1 %v3066_v42, %s2341_s25 }
 0x2a7   : > { %1229 = vrot.lane.b32.xlu0 %v3068_v27, %s2341_s25 }
 0x2a8   : > { %1231 = vrot.lane.b32.xlu1 %v3072_v9, %s2341_s25 }
 0x2ab   : > { %1249 = vrot.lane.b32.xlu0 %v3064_v17, %s2342_s9 }
 0x2ac   : > { %1251 = vrot.lane.b32.xlu1 %v3066_v42, %s2342_s9 }
 0x2af   : > { %1253 = vrot.lane.b32.xlu0 %v3068_v27, %s2342_s9 }
 0x2b0   : > { %1255 = vrot.lane.b32.xlu1 %v3072_v9, %s2342_s9  ;;  %s2253_s9 = scalar_lea.vmem %s3532_s27, 512 }
 0x2b1   : > { %p2254_p1 = scmp.ne.s32.totalorder %s3532_s27, %s2253_s9 }
 0x2b3   : > { %1273 = vrot.lane.b32.xlu0 %v3064_v17, %s2343_s13  ;;  %p2255_p4 = pnand %p2254_p1, %p2520_p6 }
 0x2b4   : > { %1275 = vrot.lane.b32.xlu1 %v3066_v42, %s2343_s13 }
 0x2b5   : > { %p2256_p8 = pneg %p2255_p4 }
 0x2b7   : > { %1277 = vrot.lane.b32.xlu0 %v3068_v27, %s2343_s13 }
 0x2b8   : > { %1279 = vrot.lane.b32.xlu1 %v3072_v9, %s2343_s13  ;;  %s2352_s13 = smov [#allocation11]  }
 0x2bb   : > { %1297 = vrot.lane.b32.xlu0 %v3064_v17, %s2344_s28 }
 0x2bc   : > { %1299 = vrot.lane.b32.xlu1 %v3066_v42, %s2344_s28 }
 0x2bf   : > { %1301 = vrot.lane.b32.xlu0 %v3068_v27, %s2344_s28 }
 0x2c0   : > { %1303 = vrot.lane.b32.xlu1 %v3072_v9, %s2344_s28  ;;  %s2257_s28 = sshll.u32 %s2352_s13, 4  ;;  %s2258_s28 = int_to_ptr.vmem [resolvable:$false] %s2257_s28 }
 0x2c1   : > { %p2260_p3 = scmp.lt.s32.totalorder %s3532_s27, %s2258_s28 }
 0x2c3   : > { %1321 = vrot.lane.b32.xlu0 %v3064_v17, %s2345_s30 }
 0x2c4   : > { %1323 = vrot.lane.b32.xlu1 %v3066_v42, %s2345_s30 }
 0x2c7   : > { %1325 = vrot.lane.b32.xlu0 %v3068_v27, %s2345_s30 }
 0x2c8   : > { %1327 = vrot.lane.b32.xlu1 %v3072_v9, %s2345_s30  ;;  %s2259_s30 = scalar_lea.vmem %s2258_s28, 1024 }
 0x2c9   : > { %p2261_p7 = scmp.lt.s32.totalorder %s2259_s30, %s2253_s9 }
 0x2cb   : > { %1345 = vrot.lane.b32.xlu0 %v3064_v17, %s2346_s14  ;;  %p2262_p10 = por %p2261_p7, %p2260_p3 }
 0x2cc   : > { %1347 = vrot.lane.b32.xlu1 %v3066_v42, %s2346_s14 }
 0x2cd   : > { %p2263_p13 = pnand %p2262_p10, %p2256_p8 }
 0x2cf   : > { %1349 = vrot.lane.b32.xlu0 %v3068_v27, %s2346_s14 }
 0x2d0   : > { %1351 = vrot.lane.b32.xlu1 %v3072_v9, %s2346_s14 }
 0x2d3   : > { %1369 = vrot.lane.b32.xlu0 %v3064_v17, %s2347_s20 }
 0x2d4   : > { %1371 = vrot.lane.b32.xlu1 %v3066_v42, %s2347_s20 }
 0x2d7   : > { %1373 = vrot.lane.b32.xlu0 %v3068_v27, %s2347_s20 }
 0x2d8   : > { %1375 = vrot.lane.b32.xlu1 %v3072_v9, %s2347_s20 }
 0x2db   : > { %1405 = vrot.lane.b32.xlu0 %v3064_v17, %s3646_s21 }
 0x2dc   : > { %1407 = vrot.lane.b32.xlu1 %v3066_v42, %s3646_s21 }
 0x2df   : > { %1409 = vrot.lane.b32.xlu0 %v3068_v27, %s3646_s21 }
 0x2e0   : > { %1411 = vrot.lane.b32.xlu1 %v3072_v9, %s3646_s21 }
 0x2e3   : > { %1429 = vrot.lane.b32.xlu0 %v3064_v17, %s2349_s10 }
 0x2e4   : > { %1431 = vrot.lane.b32.xlu1 %v3066_v42, %s2349_s10 }
 0x2e5   : > { %v1082_v44 = vpop.permute.xlu0 %1081 }
 0x2e6   : > { %v1084_v25 = vpop.permute.xlu1 %1083 }
 0x2e7   : > { %1433 = vrot.lane.b32.xlu0 %v3068_v27, %s2349_s10  ;;  %v1091_v0 = vsel %vm270_vm0, %v1082_v44, %v1084_v25 }
 0x2e8   : > { %1435 = vrot.lane.b32.xlu1 %v3072_v9, %s2349_s10  ;;  %v1098_v50 = vmul.f32 %v1094_v43, %v1091_v0  ;;  %v3208_v7 = vmul.f32 %v1501_v2, %v1091_v0  ;;  %v1526_v43 = vld [vmem:[#allocation9 + $0x288] sm:$0xff]  ;;  %s2035_s10 = sshll.u32 %s2399_s19, 9  ;;  %s1889_s19 = scalar_lea.sflag [#allocation5], %s2565_s26 }
 0x2e9   : > { %v1086_v14 = vpop.permute.xlu0 %1085  ;;  %v1166_v0 = vld [vmem:[#allocation9 + $0x68] sm:$0xff]  ;;  %s3530_s25 = scalar_lea.hbm %s3578_s4, %s2035_s10 }
 0x2ea   : > { %v1088_v1 = vpop.permute.xlu1 %1087  ;;  %v1090_v10 = vsel %vm270_vm0, %v1084_v25, %v1086_v14  ;;  %v1142_v25 = vld [vmem:[#allocation9 + $0x48] sm:$0xff] }
 0x2eb   : > { %1453 = vrot.lane.b32.xlu0 %v3064_v17, %s3647_s23  ;;  %v1089_v60 = vsel %vm270_vm0, %v1086_v14, %v1088_v1  ;;  %v1092_v8 = vsel %vm270_vm0, %v1088_v1, %v1082_v44  ;;  %v3214_v53 = vmul.f32 %v1502_v45, %v1090_v10  ;;  %v1099_v18 = vmul.f32 %v2136_v16, %v1090_v10  ;;  %v1525_v14 = vld [vmem:[#allocation9 + $0x280] sm:$0xff]  ;;  %v1527_v10 = vld [vmem:[#allocation9 + $0x290] sm:$0xff] }
 0x2ec   : > { %1455 = vrot.lane.b32.xlu1 %v3066_v42, %s3647_s23  ;;  %v1097_v36 = vmul.f32 %v1093_v63, %v1092_v8  ;;  %v1100_v55 = vmul.f32 %v1096_v13, %v1089_v60  ;;  %v3216_v21 = vmul.f32 %v1503_v15, %v1089_v60  ;;  %v3218_v4 = vmul.f32 %v1504_v34, %v1092_v8  ;;  %v1537_v45 = vld [vmem:[#allocation9 + $0x2a0] sm:$0xff]  ;;  %v1528_v60 = vld [vmem:[#allocation9 + $0x298] sm:$0xff] }
 0x2ed   : > { %v1106_v19 = vpop.permute.xlu0 %1105  ;;  %vm3656_vm0 = vcmp.lt.s32.totalorder %v2713_v5, 127 }
 0x2ee   : > { %v1108_v30 = vpop.permute.xlu1 %1107 }
 0x2ef   : > { %v1115_v32 = vsel %vm295_vm1, %v1106_v19, %v1108_v30  ;;  %1457 = vrot.lane.b32.xlu0 %v3068_v27, %s3647_s23 }
 0x2f0   : > { %v1122_v31 = vmul.f32 %v1118_v47, %v1115_v32  ;;  %v3210_v28 = vmul.f32 %v1513_v51, %v1115_v32  ;;  %1459 = vrot.lane.b32.xlu1 %v3072_v9, %s3647_s23  ;;  %v1141_v47 = vld [vmem:[#allocation9 + $0x40] sm:$0xff]  ;;  %v1144_v51 = vld [vmem:[#allocation9 + $0x58] sm:$0xff] }
 0x2f1   : > { %v1110_v26 = vpop.permute.xlu0 %1109 }
 0x2f2   : > { %v1114_v24 = vsel %vm295_vm1, %v1108_v30, %v1110_v26  ;;  %v1112_v33 = vpop.permute.xlu1 %1111  ;;  %v1718_v38 = vpack.c.bf16 %v1122_v31, %v1098_v50  ;;  %v1167_v31 = vld [vmem:[#allocation9 + $0x70] sm:$0xff] }
 0x2f3   : > { %v1123_v12 = vmul.f32 %v1119_v29, %v1114_v24  ;;  %v3224_v52 = vmul.f32 %v1514_v48, %v1114_v24  ;;  %v1113_v54 = vsel %vm295_vm1, %v1110_v26, %v1112_v33  ;;  %v1116_v39 = vsel %vm295_vm1, %v1112_v33, %v1106_v19  ;;  %1477 = vrot.lane.b32.xlu0 %v3064_v17, %s2351_s6  ;;  %v1538_v29 = vld [vmem:[#allocation9 + $0x2a8] sm:$0xff]  ;;  %v1165_v48 = vld [vmem:[#allocation9 + $0x60] sm:$0xff]  ;;  %v1540_v24 = vld [vmem:[#allocation9 + $0x2b8] sm:$0xff] }
 0x2f4   : > { %v1121_v46 = vmul.f32 %v1117_v49, %v1116_v39  ;;  %v1124_v56 = vmul.f32 %v1120_v58, %v1113_v54  ;;  %v3232_v35 = vmul.f32 %v1515_v61, %v1113_v54  ;;  %v3234_v40 = vmul.f32 %v1516_v62, %v1116_v39  ;;  %1479 = vrot.lane.b32.xlu1 %v3066_v42, %s2351_s6  ;;  %v1168_v61 = vld [vmem:[#allocation9 + $0x78] sm:$0xff]  ;;  %v1539_v62 = vld [vmem:[#allocation9 + $0x2b0] sm:$0xff] }
 0x2f5   : > { %1798 = vmatprep.subr.bf16.mxu0 %v1718_v38  ;;  %v1130_v22 = vpop.permute.xlu0 %1129  ;;  %v1719_v23 = vpack.c.bf16 %v1123_v12, %v1099_v18  ;;  %v1143_v33 = vld [vmem:[#allocation9 + $0x50] sm:$0xff]  ;;  %vm3657_vm1 = vcmp.lt.s32.totalorder %v2713_v5, 121 }
 0x2f6   : > { %v1717_v37 = vpack.c.bf16 %v1121_v46, %v1097_v36  ;;  %v1132_v6 = vpop.permute.xlu1 %1131  ;;  %v1720_v41 = vpack.c.bf16 %v1124_v56, %v1100_v55 }
 0x2f7   : > { %1481 = vrot.lane.b32.xlu0 %v3068_v27, %s2351_s6  ;;  %v1139_v1 = vsel %vm320_vm2, %v1130_v22, %v1132_v6 }
 0x2f8   : > { %1483 = vrot.lane.b32.xlu1 %v3072_v9, %s2351_s6  ;;  %1799 = vmatpush1.bf16.msra.mxu0 %v1717_v37  ;;  %v1146_v30 = vmul.f32 %v1142_v25, %v1139_v1  ;;  %v3258_v34 = vmul.f32 %v1525_v14, %v1139_v1  ;;  %v3284_v14 = vld [vmem:[#allocation8] sm:$0xff] }
 0x2f9   : > { %1839 = vmatprep.subr.bf16.mxu1 %v1720_v41  ;;  %v1134_v20 = vpop.permute.xlu0 %1133  ;;  %3648 = vst [vmem:[#allocation19_spill] sm:$0xff] %v3284_v14  ;;  %v1588_v25 = vld [vmem:[#allocation9 + $0x338] sm:$0xff] }
 0x2fa   : > { %1840 = vmatpush1.bf16.msra.mxu1 %v1719_v23  ;;  %v1136_v44 = vpop.permute.xlu1 %1135  ;;  %v1138_v19 = vsel %vm320_vm2, %v1132_v6, %v1134_v20 }
 0x2fb   : > { %v1137_v63 = vsel %vm320_vm2, %v1134_v20, %v1136_v44  ;;  %v1140_v13 = vsel %vm320_vm2, %v1136_v44, %v1130_v22  ;;  %v3262_v49 = vmul.f32 %v1526_v43, %v1138_v19  ;;  %v1147_v20 = vmul.f32 %v1143_v33, %v1138_v19  ;;  %v1261_v43 = vld [vmem:[#allocation9 + $0xe0] sm:$0xff]  ;;  %vm3658_vm2 = vmmov %vm3656_vm0 }
 0x2fc   : > { %v1145_v36 = vmul.f32 %v1141_v47, %v1140_v13  ;;  %v1148_v55 = vmul.f32 %v1144_v51, %v1137_v63  ;;  %v3264_v26 = vmul.f32 %v1527_v10, %v1137_v63  ;;  %v3266_v38 = vmul.f32 %v1528_v60, %v1140_v13  ;;  %v1190_v63 = vld [vmem:[#allocation9 + $0x88] sm:$0xff]  ;;  %v1549_v13 = vld [vmem:[#allocation9 + $0x2c0] sm:$0xff] }
 0x2fd   : > { %v1154_v2 = vpop.permute.xlu0 %1153  ;;  %v2024_v51 = vcombine.high %v3284_v14, %v3284_v14  ;;  %v1550_v60 = vld [vmem:[#allocation9 + $0x2c8] sm:$0xff] }
 0x2fe   : > { %v1156_v15 = vpop.permute.xlu1 %1155 }
 0x2ff   : > { %v1163_v8 = vsel %vm345_vm3, %v1154_v2, %v1156_v15  ;;  %2026 = vmatprep.mubr.msk.bf16.mxu0 %vm977_vm4, %v2024_v51  ;;  %2028 = vmatprep.mubr.msk.bf16.mxu1 %vm977_vm4, %v2024_v51  ;;  %v1191_v51 = vld [vmem:[#allocation9 + $0x90] sm:$0xff]  ;;  %vm3660_vm4 = vmmov %vm3656_vm0 }
 0x300   : > { %v1170_v32 = vmul.f32 %v1166_v0, %v1163_v8  ;;  %v3260_v50 = vmul.f32 %v1537_v45, %v1163_v8 }
 0x301   : > { %v1158_v58 = vpop.permute.xlu0 %1157 }
 0x302   : > { %v1162_v54 = vsel %vm345_vm3, %v1156_v15, %v1158_v58  ;;  %v1160_v39 = vpop.permute.xlu1 %1159  ;;  %v1722_v46 = vpack.c.bf16 %v1170_v32, %v1146_v30  ;;  %v1214_v30 = vld [vmem:[#allocation9 + $0xa8] sm:$0xff]  ;;  %v1561_v32 = vld [vmem:[#allocation9 + $0x2e0] sm:$0xff] }
 0x303   : > { %v1171_v56 = vmul.f32 %v1167_v31, %v1162_v54  ;;  %v3272_v16 = vmul.f32 %v1538_v29, %v1162_v54  ;;  %v1161_v18 = vsel %vm345_vm3, %v1158_v58, %v1160_v39  ;;  %v1164_v22 = vsel %vm345_vm3, %v1160_v39, %v1154_v2  ;;  %v1189_v29 = vld [vmem:[#allocation9 + $0x80] sm:$0xff]  ;;  %vm3659_vm3 = vmmov %vm3656_vm0 }
 0x304   : > { %v1169_v37 = vmul.f32 %v1165_v48, %v1164_v22  ;;  %v1172_v6 = vmul.f32 %v1168_v61, %v1161_v18  ;;  %v3278_v41 = vmul.f32 %v1539_v62, %v1161_v18  ;;  %v3280_v23 = vmul.f32 %v1540_v24, %v1164_v22  ;;  %1800 = vmatprep.subr.bf16.mxu0 %v1722_v46  ;;  %v1192_v48 = vld [vmem:[#allocation9 + $0x98] sm:$0xff]  ;;  %v1562_v18 = vld [vmem:[#allocation9 + $0x2e8] sm:$0xff]  ;;  %v1213_v22 = vld [vmem:[#allocation9 + $0xa0] sm:$0xff] }
 0x305   : > { %v1178_v44 = vpop.permute.xlu0 %1177  ;;  %v1723_v47 = vpack.c.bf16 %v1171_v56, %v1147_v20  ;;  %v1552_v62 = vld [vmem:[#allocation9 + $0x2d8] sm:$0xff]  ;;  %v1215_v56 = vld [vmem:[#allocation9 + $0xb0] sm:$0xff] }
 0x306   : > { %v1721_v1 = vpack.c.bf16 %v1169_v37, %v1145_v36  ;;  %v1180_v0 = vpop.permute.xlu1 %1179  ;;  %v1724_v2 = vpack.c.bf16 %v1172_v6, %v1148_v55  ;;  %v1551_v36 = vld [vmem:[#allocation9 + $0x2d0] sm:$0xff] }
 0x307   : > { %v1187_v15 = vsel %vm370_vm5, %v1178_v44, %v1180_v0 }
 0x308   : > { %1801 = vmatpush1.bf16.msra.mxu0 %v1721_v1  ;;  %1841 = vmatprep.subr.bf16.mxu1 %v1724_v2  ;;  %v1194_v33 = vmul.f32 %v1190_v63, %v1187_v15  ;;  %v3304_v54 = vmul.f32 %v1549_v13, %v1187_v15  ;;  %v1563_v2 = vld [vmem:[#allocation9 + $0x2f0] sm:$0xff] }
 0x309   : > { %v1182_v19 = vpop.permute.xlu0 %1181  ;;  %1842 = vmatpush1.bf16.msra.mxu1 %v1723_v47  ;;  %v1564_v47 = vld [vmem:[#allocation9 + $0x2f8] sm:$0xff] }
 0x30a   : > { %v1184_v10 = vpop.permute.xlu1 %1183  ;;  %v1186_v31 = vsel %vm370_vm5, %v1180_v0, %v1182_v19  ;;  %v1216_v0 = vld [vmem:[#allocation9 + $0xb8] sm:$0xff] }
 0x30b   : > { %v1185_v55 = vsel %vm370_vm5, %v1182_v19, %v1184_v10  ;;  %v1188_v58 = vsel %vm370_vm5, %v1184_v10, %v1178_v44  ;;  %v3308_v37 = vmul.f32 %v1550_v60, %v1186_v31  ;;  %vm3661_vm5 = vmmov %vm3657_vm1 }
 0x30c   : > { %v1193_v6 = vmul.f32 %v1189_v29, %v1188_v58  ;;  %v1196_v20 = vmul.f32 %v1192_v48, %v1185_v55  ;;  %v3310_v1 = vmul.f32 %v1551_v36, %v1185_v55  ;;  %v3312_v19 = vmul.f32 %v1552_v62, %v1188_v58 }
 0x30d   : > { %v1202_v8 = vpop.permute.xlu0 %1201  ;;  %v1195_v62 = vmul.f32 %v1191_v51, %v1186_v31  ;;  %v1238_v31 = vld [vmem:[#allocation9 + $0xc8] sm:$0xff] }
 0x30e   : > { %v1204_v61 = vpop.permute.xlu1 %1203  ;;  %3649 = vst [vmem:[#allocation18_spill] sm:$0xff] %v3310_v1 }
 0x30f   : > { %v1211_v24 = vsel %vm395_vm6, %v1202_v8, %v1204_v61 }
 0x310   : > { %v1218_v39 = vmul.f32 %v1214_v30, %v1211_v24  ;;  %v3306_v46 = vmul.f32 %v1561_v32, %v1211_v24 }
 0x311   : > { %v1206_v44 = vpop.permute.xlu0 %1205 }
 0x312   : > { %v1210_v63 = vsel %vm395_vm6, %v1204_v61, %v1206_v44  ;;  %v1208_v13 = vpop.permute.xlu1 %1207  ;;  %v1726_v15 = vpack.c.bf16 %v1218_v39, %v1194_v33 }
 0x313   : > { %v1219_v60 = vmul.f32 %v1215_v56, %v1210_v63  ;;  %v3318_v30 = vmul.f32 %v1562_v18, %v1210_v63  ;;  %v1209_v32 = vsel %vm395_vm6, %v1206_v44, %v1208_v13  ;;  %v1212_v29 = vsel %vm395_vm6, %v1208_v13, %v1202_v8  ;;  %v1262_v63 = vld [vmem:[#allocation9 + $0xe8] sm:$0xff]  ;;  %v1585_v13 = vld [vmem:[#allocation9 + $0x320] sm:$0xff]  ;;  %vm3662_vm6 = vmmov %vm3657_vm1 }
 0x314   : > { %v1217_v48 = vmul.f32 %v1213_v22, %v1212_v29  ;;  %v1220_v36 = vmul.f32 %v1216_v0, %v1209_v32  ;;  %v3324_v55 = vmul.f32 %v1563_v2, %v1209_v32  ;;  %v3326_v58 = vmul.f32 %v1564_v47, %v1212_v29  ;;  %1802 = vmatprep.subr.bf16.mxu0 %v1726_v15  ;;  %v1573_v2 = vld [vmem:[#allocation9 + $0x300] sm:$0xff]  ;;  %v1240_v32 = vld [vmem:[#allocation9 + $0xd8] sm:$0xff]  ;;  %v1586_v8 = vld [vmem:[#allocation9 + $0x328] sm:$0xff] }
 0x315   : > { %v1226_v61 = vpop.permute.xlu0 %1225  ;;  %v1727_v22 = vpack.c.bf16 %v1219_v60, %v1195_v62  ;;  %v1237_v15 = vld [vmem:[#allocation9 + $0xc0] sm:$0xff]  ;;  %v1575_v60 = vld [vmem:[#allocation9 + $0x310] sm:$0xff]  ;;  %v1576_v62 = vld [vmem:[#allocation9 + $0x318] sm:$0xff] }
 0x316   : > { %v1725_v33 = vpack.c.bf16 %v1217_v48, %v1193_v6  ;;  %v1228_v56 = vpop.permute.xlu1 %1227  ;;  %v1728_v18 = vpack.c.bf16 %v1220_v36, %v1196_v20  ;;  %v1574_v6 = vld [vmem:[#allocation9 + $0x308] sm:$0xff] }
 0x317   : > { %v1235_v47 = vsel %vm420_vm7, %v1226_v61, %v1228_v56 }
 0x318   : > { %1803 = vmatpush1.bf16.msra.mxu0 %v1725_v33  ;;  %1843 = vmatprep.subr.bf16.mxu1 %v1728_v18  ;;  %v1242_v18 = vmul.f32 %v1238_v31, %v1235_v47 }
 0x319   : > { %v1230_v44 = vpop.permute.xlu0 %1229  ;;  %1844 = vmatpush1.bf16.msra.mxu1 %v1727_v22  ;;  %v3344_v22 = vmul.f32 %v1573_v2, %v1235_v47 }
 0x31a   : > { %v1232_v0 = vpop.permute.xlu1 %1231  ;;  %v1234_v20 = vsel %vm420_vm7, %v1228_v56, %v1230_v44  ;;  %v1263_v56 = vld [vmem:[#allocation9 + $0xf0] sm:$0xff] }
 0x31b   : > { %v1233_v29 = vsel %vm420_vm7, %v1230_v44, %v1232_v0  ;;  %v1236_v48 = vsel %vm420_vm7, %v1232_v0, %v1226_v61  ;;  %3650 = vst [vmem:[#allocation17_spill] sm:$0xff] %v3344_v22  ;;  %v3348_v24 = vmul.f32 %v1574_v6, %v1234_v20  ;;  %v1264_v0 = vld [vmem:[#allocation9 + $0xf8] sm:$0xff]  ;;  %v1243_v2 = vmul.f32 %v1239_v57, %v1234_v20  ;;  %v1286_v57 = vld [vmem:[#allocation9 + $0x108] sm:$0xff]  ;;  %vm3663_vm7 = vmmov %vm3657_vm1 }
 0x31c   : > { %v1241_v44 = vmul.f32 %v1237_v15, %v1236_v48  ;;  %v1244_v12 = vmul.f32 %v1240_v32, %v1233_v29  ;;  %v3350_v45 = vmul.f32 %v1575_v60, %v1233_v29  ;;  %v3352_v31 = vmul.f32 %v1576_v62, %v1236_v48 }
 0x31d   : > { %v1250_v51 = vpop.permute.xlu0 %1249 }
 0x31e   : > { %v1252_v36 = vpop.permute.xlu1 %1251  ;;  %3652 = vst [vmem:[#allocation20_spill] sm:$0xff] %v3350_v45  ;;  %3653 = vst [vmem:[#allocation16_spill] sm:$0xff] %v3352_v31 }
 0x31f   : > { %v1259_v33 = vsel %vm445_vm8, %v1250_v51, %v1252_v36 }
 0x320   : > { %v1266_v39 = vmul.f32 %v1262_v63, %v1259_v33  ;;  %v3346_v10 = vmul.f32 %v1585_v13, %v1259_v33 }
 0x321   : > { %v1254_v61 = vpop.permute.xlu0 %1253 }
 0x322   : > { %3651 = vst [vmem:[#allocation21_spill] sm:$0xff] %v3346_v10  ;;  %v1258_v47 = vsel %vm445_vm8, %v1252_v36, %v1254_v61  ;;  %v1256_v63 = vpop.permute.xlu1 %1255  ;;  %v1730_v6 = vpack.c.bf16 %v1266_v39, %v1242_v18 }
 0x323   : > { %v1267_v13 = vmul.f32 %v1263_v56, %v1258_v47  ;;  %v3358_v15 = vmul.f32 %v1586_v8, %v1258_v47  ;;  %v1257_v32 = vsel %vm445_vm8, %v1254_v61, %v1256_v63  ;;  %v1260_v60 = vsel %vm445_vm8, %v1256_v63, %v1250_v51 }
 0x324   : > { %v1265_v29 = vmul.f32 %v1261_v43, %v1260_v60  ;;  %v1268_v48 = vmul.f32 %v1264_v0, %v1257_v32  ;;  %v3364_v62 = vmul.f32 %v1587_v59, %v1257_v32  ;;  %v3366_v33 = vmul.f32 %v1588_v25, %v1260_v60  ;;  %1804 = vmatprep.subr.bf16.mxu0 %v1730_v6  ;;  %v1310_v0 = vld [vmem:[#allocation9 + $0x128] sm:$0xff]  ;;  %v1285_v6 = vld [vmem:[#allocation9 + $0x100] sm:$0xff]  ;;  %v1288_v32 = vld [vmem:[#allocation9 + $0x118] sm:$0xff] }
 0x325   : > { %v1274_v36 = vpop.permute.xlu0 %1273  ;;  %v1731_v51 = vpack.c.bf16 %v1267_v13, %v1243_v2  ;;  %v1311_v13 = vld [vmem:[#allocation9 + $0x130] sm:$0xff]  ;;  %vm3664_vm8 = vcmp.lt.s32.totalorder %v2713_v5, 119  ;;  %v3669_v5 = vpack.c.bf16 %v3234_v40, %v3218_v4  ;;  %v3674_v4 = vpack.c.bf16 %v3260_v50, %v3258_v34  ;;  %v1600_v40 = vld [vmem:[#allocation9 + $0x358] sm:$0xff] }
 0x326   : > { %3654 = vst [vmem:[#allocation22_spill] sm:$0xff] %v3364_v62  ;;  %3655 = vst [vmem:[#allocation23_spill] sm:$0xff] %v3366_v33  ;;  %v1729_v8 = vpack.c.bf16 %v1265_v29, %v1241_v44  ;;  %v1276_v56 = vpop.permute.xlu1 %1275  ;;  %v1732_v61 = vpack.c.bf16 %v1268_v48, %v1244_v12  ;;  %v2138_v34 = vld [vmem:[#allocation9 + $0x350] sm:$0xff] }
 0x327   : > { %v3376_v20 = vsel %vm470_vm9, %v1274_v36, %v1276_v56 }
 0x328   : > { %1805 = vmatpush1.bf16.msra.mxu0 %v1729_v8  ;;  %1845 = vmatprep.subr.bf16.mxu1 %v1732_v61  ;;  %v1290_v63 = vmul.f32 %v1286_v57, %v3376_v20  ;;  %v1309_v8 = vld [vmem:[#allocation9 + $0x120] sm:$0xff]  ;;  %v1312_v61 = vld [vmem:[#allocation9 + $0x138] sm:$0xff] }
 0x329   : > { %v1278_v59 = vpop.permute.xlu0 %1277  ;;  %1846 = vmatpush1.bf16.msra.mxu1 %v1731_v51  ;;  %v1287_v51 = vld [vmem:[#allocation9 + $0x110] sm:$0xff] }
 0x32a   : > { %v1280_v25 = vpop.permute.xlu1 %1279  ;;  %v3391_v18 = vsel %vm470_vm9, %v1276_v56, %v1278_v59 }
 0x32b   : > { %v3383_v60 = vsel %vm470_vm9, %v1278_v59, %v1280_v25  ;;  %v3387_v29 = vsel %vm470_vm9, %v1280_v25, %v1274_v36  ;;  %v1291_v56 = vmul.f32 %v1287_v51, %v3391_v18  ;;  %vm3665_vm9 = vmmov %vm3664_vm8 }
 0x32c   : > { %v1289_v25 = vmul.f32 %v1285_v6, %v3387_v29  ;;  %v1292_v3 = vmul.f32 %v1288_v32, %v3383_v60  ;;  %v1603_v50 = vmul.f32 %v2138_v34, %v3383_v60 }
 0x32d   : > { %v1298_v44 = vpop.permute.xlu0 %1297 }
 0x32e   : > { %v1300_v47 = vpop.permute.xlu1 %1299  ;;  %v1771_v60 = vpack.c.bf16 %v1603_v50, %v1603_v50 }
 0x32f   : > { %v1307_v12 = vsel %vm495_vm10, %v1298_v44, %v1300_v47 }
 0x330   : > { %v1314_v2 = vmul.f32 %v1310_v0, %v1307_v12 }
 0x331   : > { %v1302_v48 = vpop.permute.xlu0 %1301 }
 0x332   : > { %v1306_v57 = vsel %vm495_vm10, %v1300_v47, %v1302_v48  ;;  %v1304_v0 = vpop.permute.xlu1 %1303  ;;  %v1734_v12 = vpack.c.bf16 %v1314_v2, %v1290_v63 }
 0x333   : > { %v1315_v43 = vmul.f32 %v1311_v13, %v1306_v57  ;;  %v1305_v39 = vsel %vm495_vm10, %v1302_v48, %v1304_v0  ;;  %v1308_v36 = vsel %vm495_vm10, %v1304_v0, %v1298_v44  ;;  %v1334_v44 = vld [vmem:[#allocation9 + $0x148] sm:$0xff]  ;;  %vm3666_vm10 = vmmov %vm3664_vm8 }
 0x334   : > { %v1313_v11 = vmul.f32 %v1309_v8, %v1308_v36  ;;  %v1316_v14 = vmul.f32 %v1312_v61, %v1305_v39  ;;  %1806 = vmatprep.subr.bf16.mxu0 %v1734_v12  ;;  %v1358_v8 = vld [vmem:[#allocation9 + $0x168] sm:$0xff]  ;;  %v1357_v36 = vld [vmem:[#allocation9 + $0x160] sm:$0xff] }
 0x335   : > { %v1322_v59 = vpop.permute.xlu0 %1321  ;;  %v1735_v2 = vpack.c.bf16 %v1315_v43, %v1291_v56  ;;  %v1335_v56 = vld [vmem:[#allocation9 + $0x150] sm:$0xff] }
 0x336   : > { %v1733_v47 = vpack.c.bf16 %v1313_v11, %v1289_v25  ;;  %v1324_v45 = vpop.permute.xlu1 %1323  ;;  %v1736_v63 = vpack.c.bf16 %v1316_v14, %v1292_v3  ;;  %v1333_v11 = vld [vmem:[#allocation9 + $0x140] sm:$0xff]  ;;  %v1359_v3 = vld [vmem:[#allocation9 + $0x170] sm:$0xff]  ;;  %v1336_v14 = vld [vmem:[#allocation9 + $0x158] sm:$0xff] }
 0x337   : > { %v1331_v6 = vsel %vm520_vm11, %v1322_v59, %v1324_v45  ;;  %v1360_v25 = vld [vmem:[#allocation9 + $0x178] sm:$0xff] }
 0x338   : > { %1807 = vmatpush1.bf16.msra.mxu0 %v1733_v47  ;;  %1847 = vmatprep.subr.bf16.mxu1 %v1736_v63  ;;  %v1338_v51 = vmul.f32 %v1334_v44, %v1331_v6 }
 0x339   : > { %v1326_v13 = vpop.permute.xlu0 %1325  ;;  %1848 = vmatpush1.bf16.msra.mxu1 %v1735_v2 }
 0x33a   : > { %v1328_v48 = vpop.permute.xlu1 %1327  ;;  %v1330_v47 = vsel %vm520_vm11, %v1324_v45, %v1326_v13  ;;  %v1382_v45 = vld [vmem:[#allocation9 + $0x188] sm:$0xff] }
 0x33b   : > { %v1329_v43 = vsel %vm520_vm11, %v1326_v13, %v1328_v48  ;;  %v1332_v0 = vsel %vm520_vm11, %v1328_v48, %v1322_v59  ;;  %v1339_v10 = vmul.f32 %v1335_v56, %v1330_v47  ;;  %v1394_v13 = vld [vmem:[#allocation9 + $0x1a8] sm:$0xff]  ;;  %vm3667_vm11 = vmmov %vm3664_vm8 }
 0x33c   : > { %v1337_v59 = vmul.f32 %v1333_v11, %v1332_v0  ;;  %v1340_v48 = vmul.f32 %v1336_v14, %v1329_v43  ;;  %v1393_v11 = vld [vmem:[#allocation9 + $0x1a0] sm:$0xff]  ;;  %v1398_v14 = vmul.f32 %v1394_v13, %v3066_v42 }
 0x33d   : > { %v1346_v32 = vpop.permute.xlu0 %1345  ;;  %v1381_v0 = vld [vmem:[#allocation9 + $0x180] sm:$0xff]  ;;  %v1397_v42 = vmul.f32 %v1393_v11, %v3064_v17  ;;  %v1442_v11 = vld [vmem:[#allocation9 + $0x1e8] sm:$0xff] }
 0x33e   : > { %v1348_v39 = vpop.permute.xlu1 %1347  ;;  %v1417_v17 = vld [vmem:[#allocation9 + $0x1c0] sm:$0xff] }
 0x33f   : > { %v1355_v61 = vsel %vm545_vm12, %v1346_v32, %v1348_v39 }
 0x340   : > { %v1362_v57 = vmul.f32 %v1358_v8, %v1355_v61 }
 0x341   : > { %v1350_v12 = vpop.permute.xlu0 %1349 }
 0x342   : > { %v1354_v63 = vsel %vm545_vm12, %v1348_v39, %v1350_v12  ;;  %v1352_v2 = vpop.permute.xlu1 %1351  ;;  %v1738_v44 = vpack.c.bf16 %v1362_v57, %v1338_v51 }
 0x343   : > { %v1363_v6 = vmul.f32 %v1359_v3, %v1354_v63  ;;  %v1353_v8 = vsel %vm545_vm12, %v1350_v12, %v1352_v2  ;;  %v1356_v61 = vsel %vm545_vm12, %v1352_v2, %v1346_v32  ;;  %v1383_v32 = vld [vmem:[#allocation9 + $0x190] sm:$0xff]  ;;  %v1384_v12 = vld [vmem:[#allocation9 + $0x198] sm:$0xff] }
 0x344   : > { %v1361_v62 = vmul.f32 %v1357_v36, %v1356_v61  ;;  %v1364_v22 = vmul.f32 %v1360_v25, %v1353_v8  ;;  %1808 = vmatprep.subr.bf16.mxu0 %v1738_v44  ;;  %v1396_v36 = vld [vmem:[#allocation9 + $0x1b8] sm:$0xff]  ;;  %v1395_v25 = vld [vmem:[#allocation9 + $0x1b0] sm:$0xff] }
 0x345   : > { %v1370_v31 = vpop.permute.xlu0 %1369  ;;  %v1739_v51 = vpack.c.bf16 %v1363_v6, %v1339_v10  ;;  %v1400_v2 = vmul.f32 %v1396_v36, %v3072_v9  ;;  %v1399_v44 = vmul.f32 %v1395_v25, %v3068_v27  ;;  %v1418_v9 = vld [vmem:[#allocation9 + $0x1c8] sm:$0xff]  ;;  %v1443_v36 = vld [vmem:[#allocation9 + $0x1f0] sm:$0xff]  ;;  %v1444_v25 = vld [vmem:[#allocation9 + $0x1f8] sm:$0xff] }
 0x346   : > { %v1737_v33 = vpack.c.bf16 %v1361_v62, %v1337_v59  ;;  %v1372_v39 = vpop.permute.xlu1 %1371  ;;  %v1740_v1 = vpack.c.bf16 %v1364_v22, %v1340_v48 }
 0x347   : > { %v1379_v57 = vsel %vm570_vm13, %v1370_v31, %v1372_v39 }
 0x348   : > { %v1386_v3 = vmul.f32 %v1382_v45, %v1379_v57  ;;  %1809 = vmatpush1.bf16.msra.mxu0 %v1737_v33  ;;  %1849 = vmatprep.subr.bf16.mxu1 %v1740_v1  ;;  %v1441_v57 = vld [vmem:[#allocation9 + $0x1e0] sm:$0xff] }
 0x349   : > { %v1374_v43 = vpop.permute.xlu0 %1373  ;;  %1850 = vmatpush1.bf16.msra.mxu1 %v1739_v51 }
 0x34a   : > { %v1378_v22 = vsel %vm570_vm13, %v1372_v39, %v1374_v43  ;;  %v1376_v10 = vpop.permute.xlu1 %1375  ;;  %v1742_v62 = vpack.c.bf16 %v1398_v14, %v1386_v3  ;;  %v1420_v14 = vld [vmem:[#allocation9 + $0x1d8] sm:$0xff] }
 0x34b   : > { %v1387_v56 = vmul.f32 %v1383_v32, %v1378_v22  ;;  %v1377_v33 = vsel %vm570_vm13, %v1374_v43, %v1376_v10  ;;  %v1380_v1 = vsel %vm570_vm13, %v1376_v10, %v1370_v31  ;;  %v1419_v32 = vld [vmem:[#allocation9 + $0x1d0] sm:$0xff] }
 0x34c   : > { %v1385_v47 = vmul.f32 %v1381_v0, %v1380_v1  ;;  %v1388_v63 = vmul.f32 %v1384_v12, %v1377_v33  ;;  %1810 = vmatprep.subr.bf16.mxu0 %v1742_v62 }
 0x34d   : > { %v1406_v6 = vpop.permute.xlu0 %1405  ;;  %v1743_v48 = vpack.c.bf16 %v1399_v44, %v1387_v56 }
 0x34e   : > { %v1741_v8 = vpack.c.bf16 %v1397_v42, %v1385_v47  ;;  %v1408_v61 = vpop.permute.xlu1 %1407  ;;  %v1744_v59 = vpack.c.bf16 %v1400_v2, %v1388_v63 }
 0x34f   : > { %v1415_v51 = vsel %vm3656_vm0, %v1406_v6, %v1408_v61 }
 0x350   : > { %1811 = vmatpush1.bf16.msra.mxu0 %v1741_v8  ;;  %1851 = vmatprep.subr.bf16.mxu1 %v1744_v59  ;;  %v1421_v22 = vmul.f32 %v1417_v17, %v1415_v51 }
 0x351   : > { %v1410_v45 = vpop.permute.xlu0 %1409  ;;  %1852 = vmatpush1.bf16.msra.mxu1 %v1743_v48 }
 0x352   : > { %v1412_v13 = vpop.permute.xlu1 %1411  ;;  %v1414_v3 = vsel %vm3658_vm2, %v1408_v61, %v1410_v45 }
 0x353   : > { %v1413_v43 = vsel %vm3659_vm3, %v1410_v45, %v1412_v13  ;;  %v1416_v0 = vsel %vm3660_vm4, %v1412_v13, %v1406_v6  ;;  %v1422_v33 = vmul.f32 %v1418_v9, %v1414_v3  ;;  %v1489_v9 = vld [vmem:[#allocation9 + $0x220] sm:$0xff] }
 0x354   : > { %v1423_v63 = vmul.f32 %v1419_v32, %v1413_v43  ;;  %v1424_v2 = vmul.f32 %v1420_v14, %v1416_v0  ;;  %v1466_v32 = vld [vmem:[#allocation9 + $0x208] sm:$0xff]  ;;  %v1467_v14 = vld [vmem:[#allocation9 + $0x210] sm:$0xff]  ;;  %v1468_v0 = vld [vmem:[#allocation9 + $0x218] sm:$0xff] }
 0x355   : > { %v1430_v31 = vpop.permute.xlu0 %1429  ;;  %v1490_v43 = vld [vmem:[#allocation9 + $0x228] sm:$0xff] }
 0x356   : > { %v1432_v39 = vpop.permute.xlu1 %1431 }
 0x357   : > { %v1439_v27 = vsel %vm3657_vm1, %v1430_v31, %v1432_v39 }
 0x358   : > { %v1445_v10 = vmul.f32 %v1441_v57, %v1439_v27  ;;  %v1465_v27 = vld [vmem:[#allocation9 + $0x200] sm:$0xff] }
 0x359   : > { %v1434_v12 = vpop.permute.xlu0 %1433 }
 0x35a   : > { %v1438_v62 = vsel %vm3661_vm5, %v1432_v39, %v1434_v12  ;;  %v1436_v56 = vpop.permute.xlu1 %1435  ;;  %v1745_v59 = vpack.c.bf16 %v1445_v10, %v1421_v22  ;;  %v1491_v22 = vld [vmem:[#allocation9 + $0x230] sm:$0xff]  ;;  %v1492_v10 = vld [vmem:[#allocation9 + $0x238] sm:$0xff] }
 0x35b   : > { %v1446_v1 = vmul.f32 %v1442_v11, %v1438_v62  ;;  %v1437_v42 = vsel %vm3662_vm6, %v1434_v12, %v1436_v56  ;;  %v1440_v47 = vsel %vm3663_vm7, %v1436_v56, %v1430_v31 }
 0x35c   : > { %v1447_v44 = vmul.f32 %v1443_v36, %v1437_v42  ;;  %v1448_v6 = vmul.f32 %v1444_v25, %v1440_v47 }
 0x35d   : > { %v1454_v8 = vpop.permute.xlu0 %1453  ;;  %v1746_v61 = vpack.c.bf16 %v1446_v1, %v1422_v33 }
 0x35e   : > { %v1747_v48 = vpack.c.bf16 %v1447_v44, %v1423_v63  ;;  %v1456_v45 = vpop.permute.xlu1 %1455  ;;  %v1748_v13 = vpack.c.bf16 %v1448_v6, %v1424_v2 }
 0x35f   : > { %1812 = vmatprep.subr.bf16.mxu0 %v1746_v61  ;;  %v1463_v31 = vsel %vm657_vm14, %v1454_v8, %v1456_v45 }
 0x360   : > { %1813 = vmatpush1.bf16.msra.mxu0 %v1745_v59  ;;  %1853 = vmatprep.subr.bf16.mxu1 %v1748_v13  ;;  %v1469_v62 = vmul.f32 %v1465_v27, %v1463_v31 }
 0x361   : > { %v1458_v39 = vpop.permute.xlu0 %1457  ;;  %1854 = vmatpush1.bf16.msra.mxu1 %v1747_v48 }
 0x362   : > { %v1460_v17 = vpop.permute.xlu1 %1459  ;;  %v1462_v11 = vsel %vm657_vm14, %v1456_v45, %v1458_v39 }
 0x363   : > { %v1461_v12 = vsel %vm657_vm14, %v1458_v39, %v1460_v17  ;;  %v1464_v36 = vsel %vm657_vm14, %v1460_v17, %v1454_v8  ;;  %v1470_v42 = vmul.f32 %v1466_v32, %v1462_v11  ;;  %v3668_v39 = vpack.c.bf16 %v3224_v52, %v3214_v53  ;;  %v1598_v52 = vld [vmem:[#allocation9 + $0x348] sm:$0xff]  ;;  %v1773_v11 = vld [vmem:[%s2571_s7] sm:$0xff] }
 0x364   : > { %v1471_v44 = vmul.f32 %v1467_v14, %v1461_v12  ;;  %v1472_v6 = vmul.f32 %v1468_v0, %v1464_v36  ;;  %v3670_v17 = vpack.c.bf16 %v3210_v28, %v3208_v7  ;;  %v3673_v53 = vpack.c.bf16 %v3280_v23, %v3266_v38  ;;  %v1774_v14 = vld [vmem:[%s2571_s7 + $0x8] sm:$0xff]  ;;  %v1776_v12 = vld [vmem:[%s2571_s7 + $0x18] sm:$0xff] }
 0x365   : > { %v1478_v51 = vpop.permute.xlu0 %1477  ;;  %v3675_v7 = vpack.c.bf16 %v3318_v30, %v3308_v37  ;;  %v3676_v28 = vpack.c.bf16 %v3278_v41, %v3264_v26  ;;  %v1602_v38 = vmul.f32 %v1598_v52, %v3391_v18  ;;  %v3678_v23 = vpack.c.bf16 %v3306_v46, %v3304_v54  ;;  %v3680_v41 = vld [vmem:[#allocation18_spill] sm:$0xff]  ;;  %v3683_v30 = vld [vmem:[#allocation16_spill] sm:$0xff]  ;;  %v3685_v46 = vld [vmem:[#allocation21_spill] sm:$0xff] }
 0x366   : > { %v1480_v57 = vpop.permute.xlu1 %1479  ;;  %v3679_v26 = vpack.c.bf16 %v3358_v15, %v3348_v24  ;;  %v3681_v37 = vpack.c.bf16 %v3324_v55, %v3680_v41  ;;  %v3688_v55 = vld [vmem:[#allocation22_spill] sm:$0xff]  ;;  %v3689_v24 = vld [vmem:[#allocation20_spill] sm:$0xff]  ;;  %v1793_v32 = vsel %vm981_vm15, %v1771_v60, 0 }
 0x367   : > { %v1487_v3 = vsel %vm3664_vm8, %v1478_v51, %v1480_v57  ;;  %v3690_v15 = vpack.c.bf16 %v3688_v55, %v3689_v24 }
 0x368   : > { %v1493_v56 = vmul.f32 %v1489_v9, %v1487_v3  ;;  %v3691_v9 = vld [vmem:[#allocation19_spill] sm:$0xff] }
 0x369   : > { %v1482_v25 = vpop.permute.xlu0 %1481  ;;  %v2023_v3 = vcombine.low %v3691_v9, %v3691_v9 }
 0x36a   : > { %v1486_v33 = vsel %vm3665_vm9, %v1480_v57, %v1482_v25  ;;  %v1484_v1 = vpop.permute.xlu1 %1483  ;;  %v1749_v48 = vpack.c.bf16 %v1493_v56, %v1469_v62  ;;  %v3672_v57 = vpack.c.bf16 %v3232_v35, %v3216_v21  ;;  %v3677_v21 = vpack.c.bf16 %v3326_v58, %v3312_v19  ;;  %v2137_v35 = vld [vmem:[#allocation9 + $0x340] sm:$0xff]  ;;  %v3682_v19 = vld [vmem:[#allocation23_spill] sm:$0xff] }
 0x36b   : > { %v1494_v47 = vmul.f32 %v1490_v43, %v1486_v33  ;;  %v1485_v63 = vsel %vm3666_vm10, %v1482_v25, %v1484_v1  ;;  %v1488_v2 = vsel %vm3667_vm11, %v1484_v1, %v1478_v51  ;;  %v3671_v51 = vpack.c.bf16 %v3272_v16, %v3262_v49  ;;  %v1775_v43 = vld [vmem:[%s2571_s7 + $0x10] sm:$0xff] }
 0x36c   : > { %v1495_v8 = vmul.f32 %v1491_v22, %v1485_v63  ;;  %v1496_v61 = vmul.f32 %v1492_v10, %v1488_v2  ;;  %v1601_v49 = vmul.f32 %v2137_v35, %v3376_v20  ;;  %v1604_v16 = vmul.f32 %v1600_v40, %v3387_v29  ;;  %v3686_v29 = vld [vmem:[#allocation17_spill] sm:$0xff] }
 0x36d   : > { %v1750_v59 = vpack.c.bf16 %v1494_v47, %v1470_v42  ;;  %v3684_v58 = vpack.c.bf16 %v3682_v19, %v3683_v30  ;;  %v1770_v20 = vpack.c.bf16 %v1602_v38, %v1602_v38  ;;  %v3687_v27 = vpack.c.bf16 %v3685_v46, %v3686_v29 }
 0x36e   : > { %v1751_v45 = vpack.c.bf16 %v1495_v8, %v1471_v44  ;;  %v1752_v13 = vpack.c.bf16 %v1496_v61, %v1472_v6  ;;  %v1769_v18 = vpack.c.bf16 %v1601_v49, %v1601_v49  ;;  %v1772_v54 = vpack.c.bf16 %v1604_v16, %v1604_v16 }
 0x36f   : > { %1814 = vmatprep.subr.bf16.mxu0 %v1750_v59 }
 0x370   : > { %1815 = vmatpush1.bf16.msra.mxu0 %v1749_v48  ;;  %1855 = vmatprep.subr.bf16.mxu1 %v1752_v13  ;;  %v1787_v31 = vsel %vm981_vm15, %v1769_v18, 0 }
 0x371   : > { %1816 = vmatprep.subr.bf16.mxu0 %v3668_v39  ;;  %1856 = vmatpush1.bf16.msra.mxu1 %v1751_v45 }
 0x372   : > { %1857 = vmatprep.subr.bf16.mxu1 %v3669_v5 }
 0x374   : > { %1817 = vmatpush1.bf16.msra.mxu0 %v3670_v17 }
 0x375   : > { %1818 = vmatprep.subr.bf16.mxu0 %v3671_v51  ;;  %1858 = vmatpush1.bf16.msra.mxu1 %v3672_v57 }
 0x376   : > { %1859 = vmatprep.subr.bf16.mxu1 %v3673_v53 }
 0x378   : > { %1819 = vmatpush1.bf16.msra.mxu0 %v3674_v4 }
 0x379   : > { %1820 = vmatprep.subr.bf16.mxu0 %v3675_v7  ;;  %1860 = vmatpush1.bf16.msra.mxu1 %v3676_v28 }
 0x37a   : > { %1861 = vmatprep.subr.bf16.mxu1 %v3677_v21 }
 0x37c   : > { %1821 = vmatpush1.bf16.msra.mxu0 %v3678_v23 }
 0x37d   : > { %1822 = vmatprep.subr.bf16.mxu0 %v3679_v26  ;;  %1862 = vmatpush1.bf16.msra.mxu1 %v3681_v37 }
 0x37e   : > { %1863 = vmatprep.subr.bf16.mxu1 %v3684_v58 }
 0x380   : > { %1823 = vmatpush1.bf16.msra.mxu0 %v3687_v27 }
 0x381   : > { %2025 = vmatprep.subr.msk.bf16.mxu0 %vm981_vm15, %v1770_v20  ;;  %1864 = vmatpush1.bf16.msra.mxu1 %v3690_v15 }
 0x382   : > { %2027 = vmatprep.subr.msk.bf16.mxu1 %vm981_vm15, %v1772_v54 }
 0x384   : > { %1825 = vmatpush1.bf16.msra.mxu0 %v1787_v31 }
 0x385   : > { %1866 = vmatpush1.bf16.msra.mxu1 %v1793_v32 }
 0x387   : > { %1831 = vmatmul.mubr.bf16.vlgmr.msra.gmra.mrb[4].mxu0 %v2023_v3 }
 0x388   : > { %1872 = vmatmul.mubr.bf16.vlgmr.msra.gmra.mrb[4].mxu1 %v2023_v3 }
 0x45a   : > { %v1832_v0 = vpop.f32.mrb[4].mxu0 }
 0x45b   : > { %v1833_v36 = vadd.f32 %v1832_v0, %v1773_v11  ;;  %v1834_v25 = vpop.f32.mrb[5].mxu0  ;;  %v1873_v22 = vpop.f32.mrb[4].mxu1 }
 0x45c   : > { %v1835_v10 = vadd.f32 %v1834_v25, %v1774_v14  ;;  %v1874_v62 = vadd.f32 %v1873_v22, %v1775_v43  ;;  %v1836_v56 = vpop.f32.mrb[6].mxu0  ;;  %v1875_v33 = vpop.f32.mrb[5].mxu1 }
 0x45d   : > { %v1880_v1 = vmax.f32 %v1833_v36, 0.0  ;;  %v1876_v42 = vadd.f32 %v1875_v33, %v1776_v12  ;;  %v1837_v47 = vpop.f32.mrb[7].mxu0  ;;  %v1877_v63 = vpop.f32.mrb[6].mxu1 }
 0x45e   : > { %v1881_v2 = vmax.f32 %v1835_v10, 0.0  ;;  %v1882_v44 = vmax.f32 %v1874_v62, 0.0  ;;  %v1878_v6 = vpop.f32.mrb[7].mxu1 }
 0x45f   : > { %1884 = vst [vmem:[%s253_s29] sm:$0xff] %v1880_v1  ;;  %v1883_v8 = vmax.f32 %v1876_v42, 0.0 }
 0x460   : > { %1885 = vst [vmem:[%s253_s29 + $0x8] sm:$0xff] %v1881_v2  ;;  %1886 = vst [vmem:[%s253_s29 + $0x10] sm:$0xff] %v1882_v44 }
 0x461   : > { %1887 = vst [vmem:[%s253_s29 + $0x18] sm:$0xff] %v1883_v8 }
 0x462   : > { %2266 = shalt.err (!%p2263_p13)
}
 0x463   : > { %s2267_s26 = scalar_lea.hbm %s3530_s25, 512  ;;  %s2271_s6 = scalar_lea.hbm %s3578_s4, 1024 }
 0x464   : > { %p2268_p5 = scmp.ne.s32.totalorder %s3530_s25, %s2267_s26  ;;  %p2272_p9 = scmp.lt.u32.totalorder %s3530_s25, %s3578_s4 }
 0x465   : > { %p2273_p12 = scmp.lt.u32.totalorder %s2271_s6, %s2267_s26  ;;  %p2275_p1 = scmp.lt.u32.totalorder %s2267_s26, %s3530_s25 }
 0x466   : > { %p2269_p0 = pnand %p2268_p5, %p2520_p6 }
 0x467   : > { %p2274_p2 = por %p2273_p12, %p2272_p9 }
 0x468   : > { %p2270_p11 = pneg %p2269_p0 }
 0x469   : > { %p2276_p4 = por %p2275_p1, %p2274_p2 }
 0x46b   : > { %p2277_p8 = pnand %p2276_p4, %p2270_p11 }
 0x46d   : > { %2280 = shalt.err (!%p2277_p8)
}
 0x46e   : > { %2050 = dma.vmem_to_hbm [thread:$0]  (%p2520_p6), %s3532_s27, 512, %s3530_s25, %s1889_s19  }
 0x46f PF: > { %s1915_s10 = sand.u32 1, %s2315_s15   ;;  %p3693_p3 = scmp.ne.s32.totalorder %s3605_s22, 0 }
 0x470   : > { %p3694_p7 = scmp.ge.s32.totalorder %s2327_s18, 2  ;;  %s1916_s24 = scalar_lea.sflag [#allocation5], %s1915_s10 }
 0x472   : > { %p2067_p10 = pnand %p3694_p7, %p3693_p3 }
 0x474   : > { %2310 = dma.done.wait (!%p2067_p10), %s1916_s24, 512  }
 0x475   : > { %2312 = vsyncadd (!%p2067_p10), %s1916_s24, 4294966784  ;;  %p19_p13 = scmp.ge.s32.totalorder %s2506_s8, 4   ;;  %s3695_s15 = smov %s2319_s16 }
 0x476   : > { %s3696_s16 = smov %s2323_s17  ;;  %s3697_s17 = smov %s2516_s11 }
 0x477   : > { %s3698_s18 = smov %s2506_s8  ;;  %21 = sbr.rel (!%p19_p13) target bundleno = 7 (0x7), region = 93 }
 0x47e   :  { %1921 = vsyncpa [#allocation4], 1 }
 0x47f   :  { %1923 = vsyncpa [#allocation4 + $0x1], 1 }
 0x480   :  { %1924 = vsyncpa [#allocation7], 1 }
 0x481   :  { %1925 = vsyncpa [#allocation10], 1 }
 0x482   :  { %1926 = vsyncpa [#allocation5], 1 }
 0x483   :  { %1928 = vsyncpa [#allocation5 + $0x1], 1 }

</bundles_post_ra>
